<compile_context>
chip_gen: v7x
topology: tpu7x:2x2x1
jax: 0.10.0
libtpu: 0.0.40
codegen_flags: <defaults>
</compile_context>

<pallas_src>
import functools

import numpy as np
import jax
import jax.numpy as jnp
from jax import lax
from jax.experimental import pallas as pl
from jax.experimental.pallas import tpu as pltpu

OUT_SIZE = 224

# --- deterministic "sampled" augmentation parameters (ColorJitter ranges 0.7..1.3,
#     hue +-0.3, GaussianBlur sigma range 0.01..2.0) ---
BRIGHTNESS_F = 1.15
CONTRAST_F = 0.85
SATURATION_F = 1.20
HUE_F = 0.05
BLUR_SIGMA = 1.0
BLUR_KSIZE = 5


# ------------------------------------------------------------------ host-side weights
def _resize_weights_aa(in_size: int, out_size: int) -> np.ndarray:
    """PyTorch _upsample_bilinear2d_aa weights (antialias=True, align_corners=False)."""
    scale = in_size / out_size
    support = scale if scale >= 1.0 else 1.0
    invscale = 1.0 / scale if scale >= 1.0 else 1.0
    M = np.zeros((out_size, in_size), dtype=np.float64)
    for i in range(out_size):
        center = scale * (i + 0.5)
        xmin = max(int(center - support + 0.5), 0)
        xmax = min(int(center + support + 0.5), in_size)
        xs = np.arange(xmin, xmax, dtype=np.float64)
        w = np.maximum(0.0, 1.0 - np.abs((xs - center + 0.5) * invscale))
        tot = w.sum()
        if tot > 0.0:
            w = w / tot
        M[i, xmin:xmax] = w
    return M.astype(np.float32)


def _gaussian_blur_matrix(n: int, ksize: int, sigma: float) -> np.ndarray:
    """1-D Gaussian blur (torchvision kernel) with reflect padding, as an (n, n) matrix."""
    half = (ksize - 1) * 0.5
    x = np.linspace(-half, half, ksize)
    k = np.exp(-0.5 * (x / sigma) ** 2)
    k = k / k.sum()
    pad = ksize // 2
    B = np.zeros((n, n), dtype=np.float32)
    for i in range(n):
        for t in range(ksize):
            j = i + t - pad
            if j < 0:
                j = -j
            elif j >= n:
                j = 2 * n - 2 - j
            B[i, j] += k[t]
    return B


@functools.lru_cache(maxsize=None)
def _get_weights(H: int, W: int, train: bool):
    """Folded (blur o resize) row/col matrices, cached per shape/mode, stored as bf16."""
    Wh = _resize_weights_aa(H, OUT_SIZE)          # (224, H)
    Ww = _resize_weights_aa(W, OUT_SIZE)          # (224, W)
    if train:
        Wh = Wh @ _gaussian_blur_matrix(H, BLUR_KSIZE, BLUR_SIGMA)
        Ww = Ww @ _gaussian_blur_matrix(W, BLUR_KSIZE, BLUR_SIGMA)
    M_h = jnp.asarray(Wh, dtype=jnp.bfloat16)                              # (224, H)
    M_wT = jnp.asarray(np.ascontiguousarray(Ww.T), dtype=jnp.bfloat16)     # (W, 224)
    return M_h, M_wT


# ------------------------------------------------------------------ generation awareness
@functools.lru_cache(maxsize=None)
def _tpu_caps():
    """(bf16_valu, physical_vmem_bytes) for the attached TPU generation."""
    kind = ""
    try:
        kind = jax.devices()[0].device_kind.lower()
    except Exception:
        pass
    old_gen = any(t in kind for t in ("v2", "v3", "v4", "v5"))
    vmem_phys = None
    try:
        vmem_phys = int(pltpu.get_tpu_info().vmem_capacity_bytes)
    except Exception:
        vmem_phys = None
    if vmem_phys is None:
        # v5e/v6e have 128 MiB / TC; be conservative (v7x: 64 MiB) when unsure.
        vmem_phys = (128 << 20) if (old_gen or "v6" in kind) else (64 << 20)
    bf16_valu = not old_gen           # packed bf16 VALU exists on v6e / v7x / newer
    return bf16_valu, vmem_phys


def _pick_chunk(H: int):
    """Sublane-aligned row-chunk size so HSV temporaries stay in a few vregs."""
    if H <= 256:
        return H, 1
    for c in (256, 128, 64, 32, 16):
        if H % c == 0:
            return c, H // c
    # TODO(synk): tall frames whose height is not a multiple of 16 fall back to a single
    #   whole-plane jitter pass (larger transient VMEM footprint).
    return H, 1


# ------------------------------------------------------------------ in-kernel jitter math
def _gray(r, g, b):
    return 0.2989 * r + 0.587 * g + 0.114 * b


def _recip(x):
    # EUP approximate reciprocal (free bundle slot); done in f32 for portability, cast back.
    return pl.reciprocal(x.astype(jnp.float32), approx=True).astype(x.dtype)


def _rgb2hsv(r, g, b):
    maxc = jnp.maximum(jnp.maximum(r, g), b)
    minc = jnp.minimum(jnp.minimum(r, g), b)
    eqc = maxc == minc
    cr = maxc - minc
    ones = jnp.ones_like(maxc)
    inv_maxc = _recip(jnp.where(eqc, ones, maxc))
    s = cr * inv_maxc
    inv_cr = _recip(jnp.where(eqc, ones, cr))
    rc = (maxc - r) * inv_cr
    gc = (maxc - g) * inv_cr
    bc = (maxc - b) * inv_cr
    hr = jnp.where(maxc == r, bc - gc, 0.0)
    hg = jnp.where((maxc == g) & (maxc != r), 2.0 + rc - bc, 0.0)
    hb = jnp.where((maxc != g) & (maxc != r), 4.0 + gc - rc, 0.0)
    h = (hr + hg + hb) * (1.0 / 6.0)   # NOT wrapped; caller wraps once after the hue shift
    return h, s, maxc


def _hsv2rgb(h, s, v):
    # Arithmetic HSV->RGB (no int floor/mod, no 6-way select chain); h assumed in [0, 1).
    h6 = h * 6.0
    vs = v * s
    r = v - vs * (1.0 - jnp.clip(jnp.abs(h6 - 3.0) - 1.0, 0.0, 1.0))
    g = v - vs * (1.0 - jnp.clip(2.0 - jnp.abs(h6 - 2.0), 0.0, 1.0))
    b = v - vs * (1.0 - jnp.clip(2.0 - jnp.abs(h6 - 4.0), 0.0, 1.0))
    return r, g, b


def _brightness(v):
    return jnp.clip(BRIGHTNESS_F * v, 0.0, 1.0)


def _jitter_rest(r, g, b, cmean):
    # contrast: blend with the per-image grayscale mean (precomputed, passed as scalar)
    r = jnp.clip(CONTRAST_F * r + cmean, 0.0, 1.0)
    g = jnp.clip(CONTRAST_F * g + cmean, 0.0, 1.0)
    b = jnp.clip(CONTRAST_F * b + cmean, 0.0, 1.0)
    # saturation: blend with per-pixel grayscale
    sgray = (1.0 - SATURATION_F) * _gray(r, g, b)
    r = jnp.clip(SATURATION_F * r + sgray, 0.0, 1.0)
    g = jnp.clip(SATURATION_F * g + sgray, 0.0, 1.0)
    b = jnp.clip(SATURATION_F * b + sgray, 0.0, 1.0)
    # hue: RGB -> HSV, shift, single floor-wrap into [0, 1), HSV -> RGB
    h, s, v = _rgb2hsv(r, g, b)
    h = h + HUE_F
    h = h - jnp.floor(h)
    return _hsv2rgb(h, s, v)


# ------------------------------------------------------------------ fused kernel
def _make_fused_kernel(train: bool, height_first: bool, compute_dtype):
    dt = compute_dtype

    def kernel(x_ref, mh_ref, mwt_ref, o_ref, *scratch):
        H = x_ref.shape[2]
        W = x_ref.shape[3]

        if train:
            (jit_ref,) = scratch
            chunk, n_chunks = _pick_chunk(H)

            def load_chunk(c, r0):
                return x_ref[0, c, pl.ds(r0, chunk), :].astype(dt)

            # ---- pass 1: grayscale mean after brightness (contrast blend point), f32 acc
            def mean_body(i, acc):
                r0 = pl.multiple_of(i * chunk, chunk)
                r = _brightness(load_chunk(0, r0))
                g = _brightness(load_chunk(1, r0))
                b = _brightness(load_chunk(2, r0))
                return acc + jnp.sum(_gray(r, g, b).astype(jnp.float32))

            total = lax.fori_loop(0, n_chunks, mean_body, jnp.float32(0.0))
            cmean = ((1.0 - CONTRAST_F) * total * (1.0 / (H * W))).astype(dt)

            # ---- pass 2: full jitter, chunked so HSV temporaries stay small; results are
            #      written as bf16 straight into the matmul staging scratch.
            def jitter_body(i, carry):
                r0 = pl.multiple_of(i * chunk, chunk)
                r = _brightness(load_chunk(0, r0))
                g = _brightness(load_chunk(1, r0))
                b = _brightness(load_chunk(2, r0))
                r, g, b = _jitter_rest(r, g, b, cmean)
                jit_ref[0, pl.ds(r0, chunk), :] = r.astype(jnp.bfloat16)
                jit_ref[1, pl.ds(r0, chunk), :] = g.astype(jnp.bfloat16)
                jit_ref[2, pl.ds(r0, chunk), :] = b.astype(jnp.bfloat16)
                return carry

            lax.fori_loop(0, n_chunks, jitter_body, 0)

            def src(c):
                return jit_ref[c]                               # (H, W) bf16
        else:
            def src(c):
                return x_ref[0, c].astype(jnp.bfloat16)         # (H, W) bf16

        mh = mh_ref[...]        # (224, H) bf16
        mwt = mwt_ref[...]      # (W, 224) bf16
        # Per-channel matmuls written directly into o_ref: no concatenate / slicing copies.
        for c in range(3):
            plane = src(c)
            if height_first:
                t = jnp.dot(mh, plane, preferred_element_type=jnp.float32)        # (224, W)
                o_ref[0, c] = jnp.dot(t.astype(jnp.bfloat16), mwt,
                                      preferred_element_type=jnp.float32)         # (224, 224)
            else:
                t = jnp.dot(plane, mwt, preferred_element_type=jnp.float32)       # (H, 224)
                o_ref[0, c] = jnp.dot(mh, t.astype(jnp.bfloat16),
                                      preferred_element_type=jnp.float32)         # (224, 224)

    return kernel


# ------------------------------------------------------------------ VMEM budget
def _round_up(n: int, m: int) -> int:
    return -(-n // m) * m


def _vmem_limit_bytes(H: int, W: int, in_itemsize: int, train: bool, vmem_phys: int) -> int:
    """Scoped-VMEM budget: double-buffered I/O + weights + staging scratch + working set."""
    Hp, Wp = _round_up(H, 8), _round_up(W, 128)
    Op8, Op128 = _round_up(OUT_SIZE, 8), _round_up(OUT_SIZE, 128)
    in_b = 2 * 3 * Hp * Wp * in_itemsize                     # double-buffered input block
    out_b = 2 * 3 * Op8 * Op128 * 4                          # double-buffered f32 output block
    w_b = (Op8 * _round_up(H, 128) + _round_up(W, 16) * Op128) * 2
    stage_b = 3 * _round_up(H, 16) * Wp * 2 if train else 0  # bf16 jittered staging scratch
    chunk, _ = _pick_chunk(H)
    jit_tmp = (10 * _round_up(chunk, 8) * Wp * 4) if train else 0
    mm_tmp = 4 * max(Op8 * Wp, Hp * Op128) * 4               # per-channel matmul temporaries
    est = in_b + out_b + w_b + stage_b + jit_tmp + mm_tmp
    est = est * 5 // 4 + (2 << 20)                           # headroom for Mosaic internals
    return int(min(max(est, 16 << 20), int(vmem_phys * 0.85)))


# ------------------------------------------------------------------ cached transform builder
@functools.lru_cache(maxsize=None)
def _get_transform_fn(N: int, C: int, H: int, W: int, dtype_name: str, train: bool):
    assert C == 3, "WristCameraTransform (ColorJitter saturation/hue) expects 3 channels"
    in_dtype = jnp.dtype(dtype_name)
    M_h, M_wT = _get_weights(H, W, train)

    bf16_valu, vmem_phys = _tpu_caps()
    compute_dtype = jnp.bfloat16 if bf16_valu else jnp.float32

    # contraction order: H-first costs 224*W*(H+224) MACs, W-first 224*H*(W+224)
    height_first = H >= W
    kernel = _make_fused_kernel(train, height_first, compute_dtype)

    scratch_shapes = []
    if train:
        scratch_shapes.append(pltpu.VMEM((3, H, W), jnp.bfloat16))   # jittered staging planes

    pc = pl.pallas_call(
        kernel,
        out_shape=jax.ShapeDtypeStruct((N, C, OUT_SIZE, OUT_SIZE), jnp.float32),
        grid=(N,),
        in_specs=[
            pl.BlockSpec((1, C, H, W), lambda n: (n, 0, 0, 0)),      # native-dtype input stream
            pl.BlockSpec((OUT_SIZE, H), lambda n: (0, 0)),           # resident weight
            pl.BlockSpec((W, OUT_SIZE), lambda n: (0, 0)),           # resident weight
        ],
        out_specs=pl.BlockSpec((1, C, OUT_SIZE, OUT_SIZE), lambda n: (n, 0, 0, 0)),
        scratch_shapes=tuple(scratch_shapes),
        compiler_params=pltpu.CompilerParams(
            dimension_semantics=("parallel",),
            vmem_limit_bytes=_vmem_limit_bytes(H, W, in_dtype.itemsize, train, vmem_phys),
        ),
    )

    @jax.jit
    def run(x):
        return pc(x, M_h, M_wT)

    return run


# ------------------------------------------------------------------ module wrapper
class WristCameraTransform:
    def __init__(self, mode: str = "train"):
        self.mode = mode

    def train(self, mode: bool = True):
        self.mode = "train" if mode else "eval"
        return self

    def eval(self):
        self.mode = "eval"
        return self

    def __call__(self, x: jax.Array) -> jax.Array:
        if self.mode not in ("train", "eval"):
            raise ValueError(f"Invalid mode: {self.mode}")
        if not jnp.issubdtype(x.dtype, jnp.floating):
            # TODO(synk): uint8 frames would additionally need a 1/255 rescale to match torch.
            x = x.astype(jnp.float32)
        N, C, H, W = x.shape
        fn = _get_transform_fn(int(N), int(C), int(H), int(W), str(x.dtype),
                               self.mode == "train")
        return fn(x)


# ------------------------------------------------------------------ main
if __name__ == "__main__":
    key = jax.random.PRNGKey(0)
    x = jax.random.uniform(key, (2, 3, 16, 16), dtype=jnp.float32)  # images in [0, 1]

    model = WristCameraTransform(mode="train")
    y_train = jax.block_until_ready(model(x))
    assert y_train.shape == (2, 3, OUT_SIZE, OUT_SIZE), y_train.shape
    assert y_train.dtype == jnp.float32

    model.eval()
    y_eval = jax.block_until_ready(model(x))
    assert y_eval.shape == (2, 3, OUT_SIZE, OUT_SIZE), y_eval.shape

    # Narrow-dtype streaming path (bf16 frames -> half the input DMA) must also work.
    y_eval_bf16 = jax.block_until_ready(model(x.astype(jnp.bfloat16)))
    assert y_eval_bf16.shape == (2, 3, OUT_SIZE, OUT_SIZE)

    # Eval-mode tolerance check against a pure-JAX f32 reference of the same resize weights.
    Wh = jnp.asarray(_resize_weights_aa(16, OUT_SIZE), dtype=jnp.float32)
    Ww = jnp.asarray(_resize_weights_aa(16, OUT_SIZE), dtype=jnp.float32)
    ref = jnp.einsum("oh,nchw,pw->ncop", Wh, x, Ww)
    assert float(jnp.max(jnp.abs(y_eval - ref))) < 5e-2
    assert float(jnp.max(jnp.abs(y_eval_bf16 - ref))) < 5e-2

    assert bool(jnp.all(jnp.isfinite(y_train))) and bool(jnp.all(jnp.isfinite(y_eval)))
    print("KERNEL_OK")
</pallas_src>

<mosaic_0001>
module attributes {stable_mosaic.version = 11 : i64} {
  func.func @kernel(%arg0: i32, %arg1: memref<1x3x16x16xf32, #tpu.memory_space<vmem>>, %arg2: memref<224x16xbf16, #tpu.memory_space<vmem>>, %arg3: memref<16x224xbf16, #tpu.memory_space<vmem>>, %arg4: memref<1x3x224x224xf32, #tpu.memory_space<vmem>>, %arg5: memref<3x16x16xbf16, #tpu.memory_space<vmem>>) attributes {dimension_semantics = [#tpu.dimension_semantics<parallel>], iteration_bounds = array<i64: 2>, scalar_prefetch = 0 : i64, scratch_operands = 1 : i64, tpu.core_type = #tpu.core_type<tc>, window_params = [{transform_indices = @transform_0, window_bounds = array<i64: 1, 3, 16, 16>}, {pipeline_mode = #tpu.pipeline_mode<synchronous>, transform_indices = @transform_1, window_bounds = array<i64: 224, 16>}, {pipeline_mode = #tpu.pipeline_mode<synchronous>, transform_indices = @transform_2, window_bounds = array<i64: 16, 224>}, {transform_indices = @transform_3, window_bounds = array<i64: 1, 3, 224, 224>}]} {
    %cst = arith.constant 0.000000e+00 : f32
    %c0_i32 = arith.constant 0 : i32
    %c16_i32 = arith.constant 16 : i32
    %0 = arith.muli %c0_i32, %c16_i32 : i32
    %1 = tpu.assume_multiple %0, 16 : i32
    %c0 = arith.constant 0 : index
    %c0_0 = arith.constant 0 : index
    %2 = arith.index_cast %1 : i32 to index
    %c0_1 = arith.constant 0 : index
    %3 = vector.load %arg1[%c0, %c0_0, %2, %c0_1] : memref<1x3x16x16xf32, #tpu.memory_space<vmem>>, vector<1x1x16x16xf32>
    %4 = vector.shape_cast %3 : vector<1x1x16x16xf32> to vector<16x16xf32>
    %5 = arith.truncf %4 : vector<16x16xf32> to vector<16x16xbf16>
    %cst_2 = arith.constant 1.148440e+00 : bf16
    %6 = vector.broadcast %cst_2 : bf16 to vector<16x16xbf16>
    %7 = arith.mulf %6, %5 : vector<16x16xbf16>
    %cst_3 = arith.constant 0.000000e+00 : f32
    %cst_4 = arith.constant 1.000000e+00 : f32
    %8 = arith.truncf %cst_3 : f32 to bf16
    %9 = vector.broadcast %8 : bf16 to vector<16x16xbf16>
    %10 = arith.maximumf %9, %7 : vector<16x16xbf16>
    %11 = arith.truncf %cst_4 : f32 to bf16
    %12 = vector.broadcast %11 : bf16 to vector<16x16xbf16>
    %13 = arith.minimumf %12, %10 : vector<16x16xbf16>
    %c0_5 = arith.constant 0 : index
    %c1 = arith.constant 1 : index
    %14 = arith.index_cast %1 : i32 to index
    %c0_6 = arith.constant 0 : index
    %15 = vector.load %arg1[%c0_5, %c1, %14, %c0_6] : memref<1x3x16x16xf32, #tpu.memory_space<vmem>>, vector<1x1x16x16xf32>
    %16 = vector.shape_cast %15 : vector<1x1x16x16xf32> to vector<16x16xf32>
    %17 = arith.truncf %16 : vector<16x16xf32> to vector<16x16xbf16>
    %cst_7 = arith.constant 1.148440e+00 : bf16
    %18 = vector.broadcast %cst_7 : bf16 to vector<16x16xbf16>
    %19 = arith.mulf %18, %17 : vector<16x16xbf16>
    %cst_8 = arith.constant 0.000000e+00 : f32
    %cst_9 = arith.constant 1.000000e+00 : f32
    %20 = arith.truncf %cst_8 : f32 to bf16
    %21 = vector.broadcast %20 : bf16 to vector<16x16xbf16>
    %22 = arith.maximumf %21, %19 : vector<16x16xbf16>
    %23 = arith.truncf %cst_9 : f32 to bf16
    %24 = vector.broadcast %23 : bf16 to vector<16x16xbf16>
    %25 = arith.minimumf %24, %22 : vector<16x16xbf16>
    %c0_10 = arith.constant 0 : index
    %c2 = arith.constant 2 : index
    %26 = arith.index_cast %1 : i32 to index
    %c0_11 = arith.constant 0 : index
    %27 = vector.load %arg1[%c0_10, %c2, %26, %c0_11] : memref<1x3x16x16xf32, #tpu.memory_space<vmem>>, vector<1x1x16x16xf32>
    %28 = vector.shape_cast %27 : vector<1x1x16x16xf32> to vector<16x16xf32>
    %29 = arith.truncf %28 : vector<16x16xf32> to vector<16x16xbf16>
    %cst_12 = arith.constant 1.148440e+00 : bf16
    %30 = vector.broadcast %cst_12 : bf16 to vector<16x16xbf16>
    %31 = arith.mulf %30, %29 : vector<16x16xbf16>
    %cst_13 = arith.constant 0.000000e+00 : f32
    %cst_14 = arith.constant 1.000000e+00 : f32
    %32 = arith.truncf %cst_13 : f32 to bf16
    %33 = vector.broadcast %32 : bf16 to vector<16x16xbf16>
    %34 = arith.maximumf %33, %31 : vector<16x16xbf16>
    %35 = arith.truncf %cst_14 : f32 to bf16
    %36 = vector.broadcast %35 : bf16 to vector<16x16xbf16>
    %37 = arith.minimumf %36, %34 : vector<16x16xbf16>
    %cst_15 = arith.constant 2.988280e-01 : bf16
    %38 = vector.broadcast %cst_15 : bf16 to vector<16x16xbf16>
    %39 = arith.mulf %38, %13 : vector<16x16xbf16>
    %cst_16 = arith.constant 5.859380e-01 : bf16
    %40 = vector.broadcast %cst_16 : bf16 to vector<16x16xbf16>
    %41 = arith.mulf %40, %25 : vector<16x16xbf16>
    %42 = arith.addf %39, %41 : vector<16x16xbf16>
    %cst_17 = arith.constant 1.137700e-01 : bf16
    %43 = vector.broadcast %cst_17 : bf16 to vector<16x16xbf16>
    %44 = arith.mulf %43, %37 : vector<16x16xbf16>
    %45 = arith.addf %42, %44 : vector<16x16xbf16>
    %46 = arith.extf %45 : vector<16x16xbf16> to vector<16x16xf32>
    %47 = vector.shape_cast %46 : vector<16x16xf32> to vector<1x16x16xf32>
    %cst_18 = arith.constant dense<0.000000e+00> : vector<1xf32>
    %48 = vector.multi_reduction <add>, %47, %cst_18 [1, 2] : vector<1x16x16xf32> to vector<1xf32>
    %49 = vector.shape_cast %48 : vector<1xf32> to vector<1x1x1xf32>
    %50 = vector.extract %49[0, 0, 0] : f32 from vector<1x1x1xf32>
    %51 = arith.addf %cst, %50 : f32
    %c1_i32 = arith.constant 1 : i32
    %cst_19 = arith.constant 1.500000e-01 : f32
    %52 = arith.mulf %cst_19, %51 : f32
    %cst_20 = arith.constant 3.906250e-03 : f32
    %53 = arith.mulf %52, %cst_20 : f32
    %54 = arith.truncf %53 : f32 to bf16
    %c0_i32_21 = arith.constant 0 : i32
    %c16_i32_22 = arith.constant 16 : i32
    %55 = arith.muli %c0_i32_21, %c16_i32_22 : i32
    %56 = tpu.assume_multiple %55, 16 : i32
    %c0_23 = arith.constant 0 : index
    %c0_24 = arith.constant 0 : index
    %57 = arith.index_cast %56 : i32 to index
    %c0_25 = arith.constant 0 : index
    %58 = vector.load %arg1[%c0_23, %c0_24, %57, %c0_25] : memref<1x3x16x16xf32, #tpu.memory_space<vmem>>, vector<1x1x16x16xf32>
    %59 = vector.shape_cast %58 : vector<1x1x16x16xf32> to vector<16x16xf32>
    %60 = arith.truncf %59 : vector<16x16xf32> to vector<16x16xbf16>
    %cst_26 = arith.constant 1.148440e+00 : bf16
    %61 = vector.broadcast %cst_26 : bf16 to vector<16x16xbf16>
    %62 = arith.mulf %61, %60 : vector<16x16xbf16>
    %cst_27 = arith.constant 0.000000e+00 : f32
    %cst_28 = arith.constant 1.000000e+00 : f32
    %63 = arith.truncf %cst_27 : f32 to bf16
    %64 = vector.broadcast %63 : bf16 to vector<16x16xbf16>
    %65 = arith.maximumf %64, %62 : vector<16x16xbf16>
    %66 = arith.truncf %cst_28 : f32 to bf16
    %67 = vector.broadcast %66 : bf16 to vector<16x16xbf16>
    %68 = arith.minimumf %67, %65 : vector<16x16xbf16>
    %c0_29 = arith.constant 0 : index
    %c1_30 = arith.constant 1 : index
    %69 = arith.index_cast %56 : i32 to index
    %c0_31 = arith.constant 0 : index
    %70 = vector.load %arg1[%c0_29, %c1_30, %69, %c0_31] : memref<1x3x16x16xf32, #tpu.memory_space<vmem>>, vector<1x1x16x16xf32>
    %71 = vector.shape_cast %70 : vector<1x1x16x16xf32> to vector<16x16xf32>
    %72 = arith.truncf %71 : vector<16x16xf32> to vector<16x16xbf16>
    %cst_32 = arith.constant 1.148440e+00 : bf16
    %73 = vector.broadcast %cst_32 : bf16 to vector<16x16xbf16>
    %74 = arith.mulf %73, %72 : vector<16x16xbf16>
    %cst_33 = arith.constant 0.000000e+00 : f32
    %cst_34 = arith.constant 1.000000e+00 : f32
    %75 = arith.truncf %cst_33 : f32 to bf16
    %76 = vector.broadcast %75 : bf16 to vector<16x16xbf16>
    %77 = arith.maximumf %76, %74 : vector<16x16xbf16>
    %78 = arith.truncf %cst_34 : f32 to bf16
    %79 = vector.broadcast %78 : bf16 to vector<16x16xbf16>
    %80 = arith.minimumf %79, %77 : vector<16x16xbf16>
    %c0_35 = arith.constant 0 : index
    %c2_36 = arith.constant 2 : index
    %81 = arith.index_cast %56 : i32 to index
    %c0_37 = arith.constant 0 : index
    %82 = vector.load %arg1[%c0_35, %c2_36, %81, %c0_37] : memref<1x3x16x16xf32, #tpu.memory_space<vmem>>, vector<1x1x16x16xf32>
    %83 = vector.shape_cast %82 : vector<1x1x16x16xf32> to vector<16x16xf32>
    %84 = arith.truncf %83 : vector<16x16xf32> to vector<16x16xbf16>
    %cst_38 = arith.constant 1.148440e+00 : bf16
    %85 = vector.broadcast %cst_38 : bf16 to vector<16x16xbf16>
    %86 = arith.mulf %85, %84 : vector<16x16xbf16>
    %cst_39 = arith.constant 0.000000e+00 : f32
    %cst_40 = arith.constant 1.000000e+00 : f32
    %87 = arith.truncf %cst_39 : f32 to bf16
    %88 = vector.broadcast %87 : bf16 to vector<16x16xbf16>
    %89 = arith.maximumf %88, %86 : vector<16x16xbf16>
    %90 = arith.truncf %cst_40 : f32 to bf16
    %91 = vector.broadcast %90 : bf16 to vector<16x16xbf16>
    %92 = arith.minimumf %91, %89 : vector<16x16xbf16>
    %cst_41 = arith.constant 8.515620e-01 : bf16
    %93 = vector.broadcast %cst_41 : bf16 to vector<16x16xbf16>
    %94 = arith.mulf %93, %68 : vector<16x16xbf16>
    %95 = vector.broadcast %54 : bf16 to vector<16x16xbf16>
    %96 = arith.addf %94, %95 : vector<16x16xbf16>
    %cst_42 = arith.constant 0.000000e+00 : f32
    %cst_43 = arith.constant 1.000000e+00 : f32
    %97 = arith.truncf %cst_42 : f32 to bf16
    %98 = vector.broadcast %97 : bf16 to vector<16x16xbf16>
    %99 = arith.maximumf %98, %96 : vector<16x16xbf16>
    %100 = arith.truncf %cst_43 : f32 to bf16
    %101 = vector.broadcast %100 : bf16 to vector<16x16xbf16>
    %102 = arith.minimumf %101, %99 : vector<16x16xbf16>
    %cst_44 = arith.constant 8.515620e-01 : bf16
    %103 = vector.broadcast %cst_44 : bf16 to vector<16x16xbf16>
    %104 = arith.mulf %103, %80 : vector<16x16xbf16>
    %105 = vector.broadcast %54 : bf16 to vector<16x16xbf16>
    %106 = arith.addf %104, %105 : vector<16x16xbf16>
    %cst_45 = arith.constant 0.000000e+00 : f32
    %cst_46 = arith.constant 1.000000e+00 : f32
    %107 = arith.truncf %cst_45 : f32 to bf16
    %108 = vector.broadcast %107 : bf16 to vector<16x16xbf16>
    %109 = arith.maximumf %108, %106 : vector<16x16xbf16>
    %110 = arith.truncf %cst_46 : f32 to bf16
    %111 = vector.broadcast %110 : bf16 to vector<16x16xbf16>
    %112 = arith.minimumf %111, %109 : vector<16x16xbf16>
    %cst_47 = arith.constant 8.515620e-01 : bf16
    %113 = vector.broadcast %cst_47 : bf16 to vector<16x16xbf16>
    %114 = arith.mulf %113, %92 : vector<16x16xbf16>
    %115 = vector.broadcast %54 : bf16 to vector<16x16xbf16>
    %116 = arith.addf %114, %115 : vector<16x16xbf16>
    %cst_48 = arith.constant 0.000000e+00 : f32
    %cst_49 = arith.constant 1.000000e+00 : f32
    %117 = arith.truncf %cst_48 : f32 to bf16
    %118 = vector.broadcast %117 : bf16 to vector<16x16xbf16>
    %119 = arith.maximumf %118, %116 : vector<16x16xbf16>
    %120 = arith.truncf %cst_49 : f32 to bf16
    %121 = vector.broadcast %120 : bf16 to vector<16x16xbf16>
    %122 = arith.minimumf %121, %119 : vector<16x16xbf16>
    %cst_50 = arith.constant 2.988280e-01 : bf16
    %123 = vector.broadcast %cst_50 : bf16 to vector<16x16xbf16>
    %124 = arith.mulf %123, %102 : vector<16x16xbf16>
    %cst_51 = arith.constant 5.859380e-01 : bf16
    %125 = vector.broadcast %cst_51 : bf16 to vector<16x16xbf16>
    %126 = arith.mulf %125, %112 : vector<16x16xbf16>
    %127 = arith.addf %124, %126 : vector<16x16xbf16>
    %cst_52 = arith.constant 1.137700e-01 : bf16
    %128 = vector.broadcast %cst_52 : bf16 to vector<16x16xbf16>
    %129 = arith.mulf %128, %122 : vector<16x16xbf16>
    %130 = arith.addf %127, %129 : vector<16x16xbf16>
    %cst_53 = arith.constant -2.001950e-01 : bf16
    %131 = vector.broadcast %cst_53 : bf16 to vector<16x16xbf16>
    %132 = arith.mulf %131, %130 : vector<16x16xbf16>
    %cst_54 = arith.constant 1.203130e+00 : bf16
    %133 = vector.broadcast %cst_54 : bf16 to vector<16x16xbf16>
    %134 = arith.mulf %133, %102 : vector<16x16xbf16>
    %135 = arith.addf %134, %132 : vector<16x16xbf16>
    %cst_55 = arith.constant 0.000000e+00 : f32
    %cst_56 = arith.constant 1.000000e+00 : f32
    %136 = arith.truncf %cst_55 : f32 to bf16
    %137 = vector.broadcast %136 : bf16 to vector<16x16xbf16>
    %138 = arith.maximumf %137, %135 : vector<16x16xbf16>
    %139 = arith.truncf %cst_56 : f32 to bf16
    %140 = vector.broadcast %139 : bf16 to vector<16x16xbf16>
    %141 = arith.minimumf %140, %138 : vector<16x16xbf16>
    %cst_57 = arith.constant 1.203130e+00 : bf16
    %142 = vector.broadcast %cst_57 : bf16 to vector<16x16xbf16>
    %143 = arith.mulf %142, %112 : vector<16x16xbf16>
    %144 = arith.addf %143, %132 : vector<16x16xbf16>
    %cst_58 = arith.constant 0.000000e+00 : f32
    %cst_59 = arith.constant 1.000000e+00 : f32
    %145 = arith.truncf %cst_58 : f32 to bf16
    %146 = vector.broadcast %145 : bf16 to vector<16x16xbf16>
    %147 = arith.maximumf %146, %144 : vector<16x16xbf16>
    %148 = arith.truncf %cst_59 : f32 to bf16
    %149 = vector.broadcast %148 : bf16 to vector<16x16xbf16>
    %150 = arith.minimumf %149, %147 : vector<16x16xbf16>
    %cst_60 = arith.constant 1.203130e+00 : bf16
    %151 = vector.broadcast %cst_60 : bf16 to vector<16x16xbf16>
    %152 = arith.mulf %151, %122 : vector<16x16xbf16>
    %153 = arith.addf %152, %132 : vector<16x16xbf16>
    %cst_61 = arith.constant 0.000000e+00 : f32
    %cst_62 = arith.constant 1.000000e+00 : f32
    %154 = arith.truncf %cst_61 : f32 to bf16
    %155 = vector.broadcast %154 : bf16 to vector<16x16xbf16>
    %156 = arith.maximumf %155, %153 : vector<16x16xbf16>
    %157 = arith.truncf %cst_62 : f32 to bf16
    %158 = vector.broadcast %157 : bf16 to vector<16x16xbf16>
    %159 = arith.minimumf %158, %156 : vector<16x16xbf16>
    %160 = arith.maximumf %141, %150 : vector<16x16xbf16>
    %161 = arith.maximumf %160, %159 : vector<16x16xbf16>
    %162 = arith.minimumf %141, %150 : vector<16x16xbf16>
    %163 = arith.minimumf %162, %159 : vector<16x16xbf16>
    %164 = arith.cmpf oeq, %161, %163 : vector<16x16xbf16>
    %165 = arith.subf %161, %163 : vector<16x16xbf16>
    %cst_63 = arith.constant 1.000000e+00 : bf16
    %166 = vector.broadcast %cst_63 : bf16 to vector<16x16xbf16>
    %167 = arith.select %164, %166, %161 : vector<16x16xi1>, vector<16x16xbf16>
    %168 = arith.extf %167 : vector<16x16xbf16> to vector<16x16xf32>
    %169 = tpu.reciprocal %168 {approx = true} : vector<16x16xf32> -> vector<16x16xf32>
    %170 = arith.truncf %169 : vector<16x16xf32> to vector<16x16xbf16>
    %171 = arith.mulf %165, %170 : vector<16x16xbf16>
    %172 = arith.select %164, %166, %165 : vector<16x16xi1>, vector<16x16xbf16>
    %173 = arith.extf %172 : vector<16x16xbf16> to vector<16x16xf32>
    %174 = tpu.reciprocal %173 {approx = true} : vector<16x16xf32> -> vector<16x16xf32>
    %175 = arith.truncf %174 : vector<16x16xf32> to vector<16x16xbf16>
    %176 = arith.subf %161, %141 : vector<16x16xbf16>
    %177 = arith.mulf %176, %175 : vector<16x16xbf16>
    %178 = arith.subf %161, %150 : vector<16x16xbf16>
    %179 = arith.mulf %178, %175 : vector<16x16xbf16>
    %180 = arith.subf %161, %159 : vector<16x16xbf16>
    %181 = arith.mulf %180, %175 : vector<16x16xbf16>
    %182 = arith.cmpf oeq, %161, %141 : vector<16x16xbf16>
    %183 = arith.subf %181, %179 : vector<16x16xbf16>
    %cst_64 = arith.constant 0.000000e+00 : f32
    %184 = arith.truncf %cst_64 : f32 to bf16
    %185 = vector.broadcast %184 : bf16 to vector<16x16xbf16>
    %186 = arith.select %182, %183, %185 : vector<16x16xi1>, vector<16x16xbf16>
    %187 = arith.cmpf oeq, %161, %150 : vector<16x16xbf16>
    %188 = arith.cmpf one, %161, %141 : vector<16x16xbf16>
    %189 = arith.andi %187, %188 : vector<16x16xi1>
    %cst_65 = arith.constant 2.000000e+00 : bf16
    %190 = vector.broadcast %cst_65 : bf16 to vector<16x16xbf16>
    %191 = arith.addf %190, %177 : vector<16x16xbf16>
    %192 = arith.subf %191, %181 : vector<16x16xbf16>
    %cst_66 = arith.constant 0.000000e+00 : f32
    %193 = arith.truncf %cst_66 : f32 to bf16
    %194 = vector.broadcast %193 : bf16 to vector<16x16xbf16>
    %195 = arith.select %189, %192, %194 : vector<16x16xi1>, vector<16x16xbf16>
    %196 = arith.cmpf one, %161, %150 : vector<16x16xbf16>
    %197 = arith.cmpf one, %161, %141 : vector<16x16xbf16>
    %198 = arith.andi %196, %197 : vector<16x16xi1>
    %cst_67 = arith.constant 4.000000e+00 : bf16
    %199 = vector.broadcast %cst_67 : bf16 to vector<16x16xbf16>
    %200 = arith.addf %199, %179 : vector<16x16xbf16>
    %201 = arith.subf %200, %177 : vector<16x16xbf16>
    %cst_68 = arith.constant 0.000000e+00 : f32
    %202 = arith.truncf %cst_68 : f32 to bf16
    %203 = vector.broadcast %202 : bf16 to vector<16x16xbf16>
    %204 = arith.select %198, %201, %203 : vector<16x16xi1>, vector<16x16xbf16>
    %205 = arith.addf %186, %195 : vector<16x16xbf16>
    %206 = arith.addf %205, %204 : vector<16x16xbf16>
    %cst_69 = arith.constant 1.669920e-01 : bf16
    %207 = vector.broadcast %cst_69 : bf16 to vector<16x16xbf16>
    %208 = arith.mulf %206, %207 : vector<16x16xbf16>
    %cst_70 = arith.constant 5.004880e-02 : bf16
    %209 = vector.broadcast %cst_70 : bf16 to vector<16x16xbf16>
    %210 = arith.addf %208, %209 : vector<16x16xbf16>
    %211 = math.floor %210 : vector<16x16xbf16>
    %212 = arith.subf %210, %211 : vector<16x16xbf16>
    %cst_71 = arith.constant 6.000000e+00 : bf16
    %213 = vector.broadcast %cst_71 : bf16 to vector<16x16xbf16>
    %214 = arith.mulf %212, %213 : vector<16x16xbf16>
    %215 = arith.mulf %161, %171 : vector<16x16xbf16>
    %cst_72 = arith.constant 3.000000e+00 : bf16
    %216 = vector.broadcast %cst_72 : bf16 to vector<16x16xbf16>
    %217 = arith.subf %214, %216 : vector<16x16xbf16>
    %218 = math.absf %217 : vector<16x16xbf16>
    %cst_73 = arith.constant 1.000000e+00 : bf16
    %219 = vector.broadcast %cst_73 : bf16 to vector<16x16xbf16>
    %220 = arith.subf %218, %219 : vector<16x16xbf16>
    %cst_74 = arith.constant 0.000000e+00 : f32
    %cst_75 = arith.constant 1.000000e+00 : f32
    %221 = arith.truncf %cst_74 : f32 to bf16
    %222 = vector.broadcast %221 : bf16 to vector<16x16xbf16>
    %223 = arith.maximumf %222, %220 : vector<16x16xbf16>
    %224 = arith.truncf %cst_75 : f32 to bf16
    %225 = vector.broadcast %224 : bf16 to vector<16x16xbf16>
    %226 = arith.minimumf %225, %223 : vector<16x16xbf16>
    %cst_76 = arith.constant 1.000000e+00 : bf16
    %227 = vector.broadcast %cst_76 : bf16 to vector<16x16xbf16>
    %228 = arith.subf %227, %226 : vector<16x16xbf16>
    %229 = arith.mulf %215, %228 : vector<16x16xbf16>
    %230 = arith.subf %161, %229 : vector<16x16xbf16>
    %cst_77 = arith.constant 2.000000e+00 : bf16
    %231 = vector.broadcast %cst_77 : bf16 to vector<16x16xbf16>
    %232 = arith.subf %214, %231 : vector<16x16xbf16>
    %233 = math.absf %232 : vector<16x16xbf16>
    %cst_78 = arith.constant 2.000000e+00 : bf16
    %234 = vector.broadcast %cst_78 : bf16 to vector<16x16xbf16>
    %235 = arith.subf %234, %233 : vector<16x16xbf16>
    %cst_79 = arith.constant 0.000000e+00 : f32
    %cst_80 = arith.constant 1.000000e+00 : f32
    %236 = arith.truncf %cst_79 : f32 to bf16
    %237 = vector.broadcast %236 : bf16 to vector<16x16xbf16>
    %238 = arith.maximumf %237, %235 : vector<16x16xbf16>
    %239 = arith.truncf %cst_80 : f32 to bf16
    %240 = vector.broadcast %239 : bf16 to vector<16x16xbf16>
    %241 = arith.minimumf %240, %238 : vector<16x16xbf16>
    %cst_81 = arith.constant 1.000000e+00 : bf16
    %242 = vector.broadcast %cst_81 : bf16 to vector<16x16xbf16>
    %243 = arith.subf %242, %241 : vector<16x16xbf16>
    %244 = arith.mulf %215, %243 : vector<16x16xbf16>
    %245 = arith.subf %161, %244 : vector<16x16xbf16>
    %cst_82 = arith.constant 4.000000e+00 : bf16
    %246 = vector.broadcast %cst_82 : bf16 to vector<16x16xbf16>
    %247 = arith.subf %214, %246 : vector<16x16xbf16>
    %248 = math.absf %247 : vector<16x16xbf16>
    %cst_83 = arith.constant 2.000000e+00 : bf16
    %249 = vector.broadcast %cst_83 : bf16 to vector<16x16xbf16>
    %250 = arith.subf %249, %248 : vector<16x16xbf16>
    %cst_84 = arith.constant 0.000000e+00 : f32
    %cst_85 = arith.constant 1.000000e+00 : f32
    %251 = arith.truncf %cst_84 : f32 to bf16
    %252 = vector.broadcast %251 : bf16 to vector<16x16xbf16>
    %253 = arith.maximumf %252, %250 : vector<16x16xbf16>
    %254 = arith.truncf %cst_85 : f32 to bf16
    %255 = vector.broadcast %254 : bf16 to vector<16x16xbf16>
    %256 = arith.minimumf %255, %253 : vector<16x16xbf16>
    %cst_86 = arith.constant 1.000000e+00 : bf16
    %257 = vector.broadcast %cst_86 : bf16 to vector<16x16xbf16>
    %258 = arith.subf %257, %256 : vector<16x16xbf16>
    %259 = arith.mulf %215, %258 : vector<16x16xbf16>
    %260 = arith.subf %161, %259 : vector<16x16xbf16>
    %c0_87 = arith.constant 0 : index
    %261 = arith.index_cast %56 : i32 to index
    %c0_88 = arith.constant 0 : index
    %262 = vector.load %arg5[%c0_87, %261, %c0_88] : memref<3x16x16xbf16, #tpu.memory_space<vmem>>, vector<1x16x16xbf16>
    %263 = vector.shape_cast %262 : vector<1x16x16xbf16> to vector<16x16xbf16>
    %264 = vector.shape_cast %230 : vector<16x16xbf16> to vector<1x16x16xbf16>
    tpu.vector_store %arg5[%c0_87, %261, %c0_88], %264 {strides = array<i32>} : memref<3x16x16xbf16, #tpu.memory_space<vmem>>, vector<1x16x16xbf16>,
    %c1_89 = arith.constant 1 : index
    %265 = arith.index_cast %56 : i32 to index
    %c0_90 = arith.constant 0 : index
    %266 = vector.load %arg5[%c1_89, %265, %c0_90] : memref<3x16x16xbf16, #tpu.memory_space<vmem>>, vector<1x16x16xbf16>
    %267 = vector.shape_cast %266 : vector<1x16x16xbf16> to vector<16x16xbf16>
    %268 = vector.shape_cast %245 : vector<16x16xbf16> to vector<1x16x16xbf16>
    tpu.vector_store %arg5[%c1_89, %265, %c0_90], %268 {strides = array<i32>} : memref<3x16x16xbf16, #tpu.memory_space<vmem>>, vector<1x16x16xbf16>,
    %c2_91 = arith.constant 2 : index
    %269 = arith.index_cast %56 : i32 to index
    %c0_92 = arith.constant 0 : index
    %270 = vector.load %arg5[%c2_91, %269, %c0_92] : memref<3x16x16xbf16, #tpu.memory_space<vmem>>, vector<1x16x16xbf16>
    %271 = vector.shape_cast %270 : vector<1x16x16xbf16> to vector<16x16xbf16>
    %272 = vector.shape_cast %260 : vector<16x16xbf16> to vector<1x16x16xbf16>
    tpu.vector_store %arg5[%c2_91, %269, %c0_92], %272 {strides = array<i32>} : memref<3x16x16xbf16, #tpu.memory_space<vmem>>, vector<1x16x16xbf16>,
    %c1_i32_93 = arith.constant 1 : i32
    %c0_94 = arith.constant 0 : index
    %c0_95 = arith.constant 0 : index
    %273 = vector.load %arg2[%c0_94, %c0_95] : memref<224x16xbf16, #tpu.memory_space<vmem>>, vector<224x16xbf16>
    %c0_96 = arith.constant 0 : index
    %c0_97 = arith.constant 0 : index
    %274 = vector.load %arg3[%c0_96, %c0_97] : memref<16x224xbf16, #tpu.memory_space<vmem>>, vector<16x224xbf16>
    %c0_98 = arith.constant 0 : index
    %c0_99 = arith.constant 0 : index
    %c0_100 = arith.constant 0 : index
    %275 = vector.load %arg5[%c0_98, %c0_99, %c0_100] : memref<3x16x16xbf16, #tpu.memory_space<vmem>>, vector<1x16x16xbf16>
    %276 = vector.shape_cast %275 : vector<1x16x16xbf16> to vector<16x16xbf16>
    %cst_101 = arith.constant dense<0.000000e+00> : vector<224x16xf32>
    %277 = tpu.matmul %273, %276, %cst_101 {dimension_numbers = #tpu.dot_dimension_numbers<[1], [0], [0], [1], [0, 0, 1, 1], [], []>} : vector<224x16xbf16>, vector<16x16xbf16>, vector<224x16xf32> -> vector<224x16xf32>
    %278 = arith.truncf %277 : vector<224x16xf32> to vector<224x16xbf16>
    %cst_102 = arith.constant dense<0.000000e+00> : vector<224x224xf32>
    %279 = tpu.matmul %278, %274, %cst_102 {dimension_numbers = #tpu.dot_dimension_numbers<[1], [0], [0], [1], [0, 0, 1, 1], [], []>} : vector<224x16xbf16>, vector<16x224xbf16>, vector<224x224xf32> -> vector<224x224xf32>
    %c0_103 = arith.constant 0 : index
    %c0_104 = arith.constant 0 : index
    %c0_105 = arith.constant 0 : index
    %c0_106 = arith.constant 0 : index
    %280 = vector.load %arg4[%c0_103, %c0_104, %c0_105, %c0_106] : memref<1x3x224x224xf32, #tpu.memory_space<vmem>>, vector<1x1x224x224xf32>
    %281 = vector.shape_cast %280 : vector<1x1x224x224xf32> to vector<224x224xf32>
    %282 = vector.shape_cast %279 : vector<224x224xf32> to vector<1x1x224x224xf32>
    tpu.vector_store %arg4[%c0_103, %c0_104, %c0_105, %c0_106], %282 {strides = array<i32>} : memref<1x3x224x224xf32, #tpu.memory_space<vmem>>, vector<1x1x224x224xf32>,
    %c1_107 = arith.constant 1 : index
    %c0_108 = arith.constant 0 : index
    %c0_109 = arith.constant 0 : index
    %283 = vector.load %arg5[%c1_107, %c0_108, %c0_109] : memref<3x16x16xbf16, #tpu.memory_space<vmem>>, vector<1x16x16xbf16>
    %284 = vector.shape_cast %283 : vector<1x16x16xbf16> to vector<16x16xbf16>
    %cst_110 = arith.constant dense<0.000000e+00> : vector<224x16xf32>
    %285 = tpu.matmul %273, %284, %cst_110 {dimension_numbers = #tpu.dot_dimension_numbers<[1], [0], [0], [1], [0, 0, 1, 1], [], []>} : vector<224x16xbf16>, vector<16x16xbf16>, vector<224x16xf32> -> vector<224x16xf32>
    %286 = arith.truncf %285 : vector<224x16xf32> to vector<224x16xbf16>
    %cst_111 = arith.constant dense<0.000000e+00> : vector<224x224xf32>
    %287 = tpu.matmul %286, %274, %cst_111 {dimension_numbers = #tpu.dot_dimension_numbers<[1], [0], [0], [1], [0, 0, 1, 1], [], []>} : vector<224x16xbf16>, vector<16x224xbf16>, vector<224x224xf32> -> vector<224x224xf32>
    %c0_112 = arith.constant 0 : index
    %c1_113 = arith.constant 1 : index
    %c0_114 = arith.constant 0 : index
    %c0_115 = arith.constant 0 : index
    %288 = vector.load %arg4[%c0_112, %c1_113, %c0_114, %c0_115] : memref<1x3x224x224xf32, #tpu.memory_space<vmem>>, vector<1x1x224x224xf32>
    %289 = vector.shape_cast %288 : vector<1x1x224x224xf32> to vector<224x224xf32>
    %290 = vector.shape_cast %287 : vector<224x224xf32> to vector<1x1x224x224xf32>
    tpu.vector_store %arg4[%c0_112, %c1_113, %c0_114, %c0_115], %290 {strides = array<i32>} : memref<1x3x224x224xf32, #tpu.memory_space<vmem>>, vector<1x1x224x224xf32>,
    %c2_116 = arith.constant 2 : index
    %c0_117 = arith.constant 0 : index
    %c0_118 = arith.constant 0 : index
    %291 = vector.load %arg5[%c2_116, %c0_117, %c0_118] : memref<3x16x16xbf16, #tpu.memory_space<vmem>>, vector<1x16x16xbf16>
    %292 = vector.shape_cast %291 : vector<1x16x16xbf16> to vector<16x16xbf16>
    %cst_119 = arith.constant dense<0.000000e+00> : vector<224x16xf32>
    %293 = tpu.matmul %273, %292, %cst_119 {dimension_numbers = #tpu.dot_dimension_numbers<[1], [0], [0], [1], [0, 0, 1, 1], [], []>} : vector<224x16xbf16>, vector<16x16xbf16>, vector<224x16xf32> -> vector<224x16xf32>
    %294 = arith.truncf %293 : vector<224x16xf32> to vector<224x16xbf16>
    %cst_120 = arith.constant dense<0.000000e+00> : vector<224x224xf32>
    %295 = tpu.matmul %294, %274, %cst_120 {dimension_numbers = #tpu.dot_dimension_numbers<[1], [0], [0], [1], [0, 0, 1, 1], [], []>} : vector<224x16xbf16>, vector<16x224xbf16>, vector<224x224xf32> -> vector<224x224xf32>
    %c0_121 = arith.constant 0 : index
    %c2_122 = arith.constant 2 : index
    %c0_123 = arith.constant 0 : index
    %c0_124 = arith.constant 0 : index
    %296 = vector.load %arg4[%c0_121, %c2_122, %c0_123, %c0_124] : memref<1x3x224x224xf32, #tpu.memory_space<vmem>>, vector<1x1x224x224xf32>
    %297 = vector.shape_cast %296 : vector<1x1x224x224xf32> to vector<224x224xf32>
    %298 = vector.shape_cast %295 : vector<224x224xf32> to vector<1x1x224x224xf32>
    tpu.vector_store %arg4[%c0_121, %c2_122, %c0_123, %c0_124], %298 {strides = array<i32>} : memref<1x3x224x224xf32, #tpu.memory_space<vmem>>, vector<1x1x224x224xf32>,
    return
  }
  func.func @transform_0(%arg0: i32) -> (i32, i32, i32, i32) {
    %c0_i32 = arith.constant 0 : i32
    %c0_i32_0 = arith.constant 0 : i32
    %c0_i32_1 = arith.constant 0 : i32
    %c0_i32_2 = arith.constant 0 : i32
    return %arg0, %c0_i32, %c0_i32_0, %c0_i32_1 : i32, i32, i32, i32
  }
  func.func @transform_1(%arg0: i32) -> (i32, i32) {
    %c0_i32 = arith.constant 0 : i32
    %c0_i32_0 = arith.constant 0 : i32
    %c0_i32_1 = arith.constant 0 : i32
    return %c0_i32, %c0_i32_0 : i32, i32
  }
  func.func @transform_2(%arg0: i32) -> (i32, i32) {
    %c0_i32 = arith.constant 0 : i32
    %c0_i32_0 = arith.constant 0 : i32
    %c0_i32_1 = arith.constant 0 : i32
    return %c0_i32, %c0_i32_0 : i32, i32
  }
  func.func @transform_3(%arg0: i32) -> (i32, i32, i32, i32) {
    %c0_i32 = arith.constant 0 : i32
    %c0_i32_0 = arith.constant 0 : i32
    %c0_i32_1 = arith.constant 0 : i32
    %c0_i32_2 = arith.constant 0 : i32
    return %arg0, %c0_i32, %c0_i32_0, %c0_i32_1 : i32, i32, i32, i32
  }
}

</mosaic_0001>

<bundles_post_ra>
// kernel: run.1
= control target key start
LH: loop header
LB: loop body
LE: loop exit
PB: predicated region body
PF: predicated region fallthrough
CT: control target
= control target key end

     0   :  { %8 = vsyncpa [#allocation4], 0  ;;  %s3332_s0 = inlined_call_operand.hbm [shape: f32[2,3,16,16], index: 0, kind: input, shape index: {}]   ;;  %s3333_s1 = inlined_call_operand.hbm [shape: bf16[224,16], index: 1, kind: input, shape index: {}]   ;;  %s3334_s2 = inlined_call_operand.vmem [shape: bf16[16,224], index: 2, kind: input, shape index: {}]   ;;  %s3335_s3 = inlined_call_operand.hbm [shape: f32[2,3,224,224], index: 3, kind: output, shape index: {}]  }
   0x1   :  { %10 = vsyncpa [#allocation4 + $0x1], 0 }
   0x2   :  { %11 = vsyncpa [#allocation7], 0 }
   0x3   :  { %12 = vsyncpa [#allocation5], 0 }
   0x4   :  { %14 = vsyncpa [#allocation5 + $0x1], 0  ;;  %s2566_s12 = smov 0   ;;  %s2568_s13 = smov 0  }
   0x5   :  { %s2570_s14 = smov 0   ;;  %s2572_s15 = smov 0  }
   0x6 LB: > { %s2587_s16 = sadd.s32 4294967295, %s2530_s15   ;;  %s1939_s17 = sadd.s32 4294967294, %s2530_s15   ;;  %s2530_s15 = sphi %s2572_s15, %s3355_s15   ;;  %s2526_s14 = sphi %s2570_s14, %s3354_s14   ;;  %s2522_s13 = sphi %s2568_s13, %s3353_s13   ;;  %s2518_s12 = sphi %s2566_s12, %s3352_s12  }
   0x7   : > { %p40_p0 = scmp.ne.s32.totalorder %s2522_s13, %s2518_s12  ;;  %p3336_p1 = scmp.eq.s32.totalorder %s2587_s16, 0 }
   0x8   : > { %p112_p3 = scmp.eq.s32.totalorder %s1939_s17, 1  ;;  %p1940_p5 = scmp.ge.s32.totalorder %s2530_s15, 1 }
   0x9   : > { %p2596_p4 = por %p3336_p1, %p40_p0  ;;  %p119_p7 = scmp.lt.s32.totalorder %s2530_s15, 3 }
   0xa   : > { %p2601_p6 = por %p112_p3, %p40_p0  ;;  %s2532_s21 = smov [#allocation6]  }
   0xb   : > { %s3339_s18 = scalar_select %p2596_p4, 1, 0 }
   0xc   : > { %s3340_s19 = scalar_select %p2601_p6, 1, 0 }
   0xd   : > { %p2606_p8 = pnand %p1940_p5, %p119_p7  ;;  %s131_s22 = sshll.u32 %s2532_s21, 4  ;;  %s2610_s22 = int_to_ptr.vmem [resolvable:$true] %s131_s22 }
   0xe   : > { %s2622_s24 = sadd.s32 1, %s2530_s15   ;;  %s27_s25 = sadd.s32 1, %s2526_s14 }
   0xf   : > { %s3341_s20 = scalar_select %p2606_p8, 1, 0 }
  0x10   : > { %p2317_p9 = pneg %p2606_p8  ;;  %s24_s26 = ssub.s32 %s2530_s15, %s2622_s24 }
  0x11   : > { %s2402_s29 = scalar_lea.hbm %s3333_s1, 1792 }
  0x12   : > { %p2617_p11 = pnand %p2317_p9, %p3336_p1  ;;  %p2403_p12 = scmp.ne.s32.totalorder %s3333_s1, %s2402_s29 }
  0x13   : > { %p2409_p5 = scmp.lt.u32.totalorder %s2402_s29, %s3333_s1 }
  0x14   : > { %p2404_p13 = pneg %p2617_p11 }
  0x16   : > { %p2405_p0 = pnand %p2404_p13, %p2403_p12 }
  0x18   : > { %p2406_p3 = pneg %p2405_p0 }
  0x1a   : > { %p2411_p7 = pnand %p2409_p5, %p2406_p3 }
  0x1c   : > { %2414 = shalt.err (!%p2411_p7)
}
  0x1d   : > { %s2415_s7 = scalar_lea.vmem %s2610_s22, 1792  ;;  %p2423_p2 = scmp.lt.s32.totalorder %s2610_s22, %s2610_s22 }
  0x1e   : > { %p2416_p9 = scmp.ne.s32.totalorder %s2610_s22, %s2415_s7  ;;  %p2424_p6 = scmp.lt.s32.totalorder %s2415_s7, %s2415_s7 }
  0x20   : > { %p2418_p10 = pnand %p2416_p9, %p2404_p13  ;;  %p2425_p4 = por %p2424_p6, %p2423_p2 }
  0x22   : > { %p2419_p1 = pneg %p2418_p10 }
  0x24   : > { %p2426_p8 = pnand %p2425_p4, %p2419_p1 }
  0x26   : > { %2429 = shalt.err (!%p2426_p8)
}
  0x27   : > { %s2533_s8 = smov 64   ;;  %s2534_s9 = smov 4  }
  0x28   : > { %2320 = dma.hbm_to_vmem [thread:$0]  (!%p2617_p11), %s3333_s1, 1792, %s2610_s22, [#allocation7], %s2533_s8, %s2533_s8, %s2534_s9  }
  0x29   : > { %p25_p2 = scmp.eq.s32.totalorder %s24_s26, 0  ;;  %p34_p1 = scmp.ne.s32.totalorder %s2526_s14, %s2522_s13 }
  0x2a   : > { %p35_p4 = scmp.eq.s32.totalorder %s2530_s15, 0  ;;  %p2330_p6 = scmp.lt.s32.totalorder %s2530_s15, 2 }
  0x2b   : > { %s2653_s17 = scalar_select %p25_p2, %s2526_s14, %s27_s25  }
  0x2c   : > { %p36_p8 = por %p35_p4, %p34_p1  ;;  %p3343_p10 = scmp.eq.s32.totalorder %s2587_s16, 1 }
  0x2d   : > { %s148_s27 = sand.u32 1, %s2526_s14   ;;  %s2303_s28 = smul.u32 768, %s2530_s15 }
  0x2e   : > { %p2657_p12 = por %p3343_p10, %p34_p1  ;;  %s2302_s29 = smul.u32 48, %s148_s27 }
  0x2f   : > { %s2666_s4 = scalar_lea.hbm %s3332_s0, %s2303_s28  ;;  %p2668_p11 = pnand %p2330_p6, %p36_p8 }
  0x30   : > { %s152_s25 = scalar_lea.vmem [#allocation3], %s2302_s29  ;;  %s2674_s5 = scalar_lea.sflag [#allocation4], %s148_s27 }
  0x31   : > { %s159_s26 = sshll.u32 %s152_s25, 4  ;;  %s2430_s6 = scalar_lea.hbm %s2666_s4, 768  ;;  %s2672_s26 = int_to_ptr.vmem [resolvable:$true] %s159_s26 }
  0x32   : > { %p2431_p13 = scmp.ne.s32.totalorder %s2666_s4, %s2430_s6  ;;  %p2432_p0 = pneg %p2668_p11 }
  0x33   : > { %s2435_s9 = scalar_lea.hbm %s3332_s0, 1536  ;;  %p2436_p7 = scmp.lt.u32.totalorder %s2666_s4, %s3332_s0 }
  0x34   : > { %p2433_p3 = pnand %p2432_p0, %p2431_p13  ;;  %p2437_p9 = scmp.lt.u32.totalorder %s2435_s9, %s2430_s6 }
  0x35   : > { %p2439_p1 = scmp.lt.u32.totalorder %s2430_s6, %s2666_s4 }
  0x36   : > { %p2434_p5 = pneg %p2433_p3  ;;  %p2438_p2 = por %p2437_p9, %p2436_p7 }
  0x38   : > { %p2440_p4 = por %p2439_p1, %p2438_p2 }
  0x3a   : > { %p2441_p6 = pnand %p2440_p4, %p2434_p5 }
  0x3c   : > { %2444 = shalt.err (!%p2441_p6)
}
  0x3d   : > { %s2445_s27 = scalar_lea.vmem %s2672_s26, 768  ;;  %s2535_s28 = smov [#allocation3]  }
  0x3e   : > { %p2446_p8 = scmp.ne.s32.totalorder %s2672_s26, %s2445_s27  ;;  %s2450_s29 = sshll.u32 %s2535_s28, 4  ;;  %s2451_s29 = int_to_ptr.vmem [resolvable:$false] %s2450_s29 }
  0x3f   : > { %s2452_s23 = scalar_lea.vmem %s2451_s29, 1536  ;;  %p2453_p3 = scmp.lt.s32.totalorder %s2672_s26, %s2451_s29 }
  0x40   : > { %p2448_p10 = pnand %p2446_p8, %p2432_p0  ;;  %p2454_p7 = scmp.lt.s32.totalorder %s2452_s23, %s2445_s27 }
  0x42   : > { %p2449_p13 = pneg %p2448_p10  ;;  %p2455_p9 = por %p2454_p7, %p2453_p3 }
  0x44   : > { %p2456_p2 = pnand %p2455_p9, %p2449_p13 }
  0x46   : > { %2459 = shalt.err (!%p2456_p2)
}
  0x47   : > { %s2536_s30 = smov 128   ;;  %s2537_s25 = smov 8  }
  0x48   : > { %2324 = dma.hbm_to_vmem [thread:$0]  (!%p2668_p11), %s2666_s4, 768, %s2672_s26, %s2674_s5, %s2536_s30, %s2536_s30, %s2537_s25  }
  0x49   : > { %p3346_p0 = scmp.ne.s32.totalorder %s3341_s20, 0 }
  0x4a   : > { %s2705_s6 = sand.u32 (!%p3346_p0), 1, %s2522_s13   ;;  %p3347_p5 = scmp.ne.s32.totalorder (!%p3346_p0), %s3339_s18, 0 }
  0x4b   : > { %171 = sbr.rel (%p3346_p0) target bundleno = 1281 (0x501), region = 32  ;;  %s174_s8 = scalar_lea.sflag (!%p3346_p0), [#allocation4], %s2705_s6 }
  0x4c   : > { %s2304_s7 = smul.u32 (!%p3346_p0), 48, %s2705_s6 }
  0x4e   : > { %s177_s9 = scalar_lea.vmem (!%p3346_p0), [#allocation3], %s2304_s7 }
  0x52   : > { %2505 = dma.done.wait (%p3347_p5), %s174_s8, 768  }
  0x53   : > { %2507 = vsyncadd (%p3347_p5), %s174_s8, 4294966528  ;;  %p3348_p1 = scmp.eq.s32.totalorder %s2587_s16, 0 }
  0x55   : > { %2509 = dma.done.wait (%p3348_p1), [#allocation7], 1792   ;;  %p3349_p11 = pmov %p3348_p1 }
  0x56   : > { %v2538_v0 = vmov 0   ;;  %v219_v1 = vld [vmem:[%s177_s9] sm:$0xff]  ;;  %v220_v2 = vld [vmem:[%s177_s9 + $0x8] sm:$0xff]  ;;  %v1946_v3 = vld [vmem:[%s177_s9 + $0x10] sm:$0xff]  ;;  %v2539_v16 = vmov 1065369472  }
  0x57   : > { %2511 = vsyncadd (%p3349_p11), [#allocation7], 4294965504  ;;  %804 = vmatprep.mubr.bf16.mxu1 %v2538_v0  ;;  %v221_v4 = vpack.c.bf16 %v220_v2, %v219_v1  ;;  %v1947_v5 = vld [vmem:[%s177_s9 + $0x18] sm:$0xff]  ;;  %v1948_v6 = vld [vmem:[%s177_s9 + $0x20] sm:$0xff]  ;;  %vm248_vm0 = vcmask 130048   ;;  %s2305_s8 = smul.u32 1344, %s2705_s6 }
  0x58   : > { %v1949_v7 = vld [vmem:[%s177_s9 + $0x28] sm:$0xff]  ;;  %v229_v8 = vpack.c.bf16 %v1947_v5, %v1946_v3  ;;  %v2738_v39 = vld [vmem:[#allocation6] sm:$0xff]   ;;  %vm916_vm8 = vcmask 785408   ;;  %s2308_s18 = smul.u32 21504, %s2587_s16  ;;  %s1839_s16 = scalar_lea.sflag [#allocation5], %s2705_s6 }
  0x59   : > { %v237_v9 = vpack.c.bf16 %v1949_v7, %v1948_v6  ;;  %v222_v10 = vmul.bf16 1066614675, %v221_v4  ;;  %v2729_v37 = vld [vmem:[%s3334_s2 + $0x4] ss:$8 sps:$4 sm:$0xff]   ;;  %v2734_v38 = vld [vmem:[%s3334_s2] ss:$8 sps:$4 sm:$0xff]   ;;  %2212 = vmatprep.mubr.msk.bf16.mxu0 %vm248_vm0, %v2738_v39 }
  0x5a   : > { %v230_v11 = vmul.bf16 1066614675, %v229_v8  ;;  %2300 = vmatprep.subr.bf16.mxu1 %v2729_v37  ;;  %s2928_s9 = scalar_lea.vmem [#allocation8], %s2305_s8 }
  0x5b   : > { %v238_v12 = vmul.bf16 1066614675, %v237_v9  ;;  %v223_v13 = vmax.bf16 %v2538_v0, %v222_v10  ;;  %2301 = vmatpush1.bf16.msra.mxu1 %v2734_v38  ;;  %s1852_s20 = sshll.u32 %s2928_s9, 4  ;;  %s3283_s20 = int_to_ptr.vmem [resolvable:$true] %s1852_s20 }
  0x5c   : > { %v231_v14 = vmax.bf16 %v2538_v0, %v230_v11 }
  0x5d   : > { %v239_v15 = vmax.bf16 %v2538_v0, %v238_v12  ;;  %v224_v17 = vmin.bf16 %v2539_v16, %v223_v13 }
  0x5e   : > { %v232_v18 = vmin.bf16 %v2539_v16, %v231_v14 }
  0x5f   : > { %v240_v19 = vmin.bf16 %v2539_v16, %v239_v15  ;;  %v241_v20 = vmul.bf16 1050230425, %v224_v17  ;;  %v274_v41 = vmul.bf16 1062879066, %v224_v17 }
  0x60   : > { %v242_v21 = vmul.bf16 1058422550, %v232_v18  ;;  %v282_v42 = vmul.bf16 1062879066, %v232_v18 }
  0x61   : > { %v244_v22 = vmul.bf16 1038695913, %v240_v19  ;;  %v286_v40 = vmul.bf16 1062879066, %v240_v19 }
  0x62   : > { %v243_v23 = vadd.bf16 %v242_v21, %v241_v20 }
  0x64   : > { %v245_v24 = vadd.bf16 %v244_v22, %v243_v23 }
  0x66   : > { %v246_v25 = vunpack.c.l.bf16 %v245_v24  ;;  %v247_v26 = vunpack.c.h.bf16 %v245_v24 }
  0x68   : > { %v249_v27 = vsel %vm248_vm0, %v246_v25, 0.0  ;;  %v250_v28 = vsel %vm248_vm0, %v247_v26, 0.0 }
  0x69   : > { %v251_v29 = vadd.f32 %v250_v28, %v249_v27 }
  0x6b   : > { %252 = vadd.xlane.f32.xlu0 %v251_v29 }
  0xf8   : > { %v253_v30 = vpop.xlane.xlu0 %252 }
  0xf9   : > { %v254_v31 = vrot.slane %v253_v30, 4 }
  0xfb   : > { %v255_v32 = vadd.f32 %v254_v31, %v253_v30 }
  0xfd   : > { %v256_v33 = vrot.slane %v255_v32, 2 }
  0xff   : > { %v257_v34 = vadd.f32 %v256_v33, %v255_v32 }
 0x101   : > { %v258_v35 = vrot.slane %v257_v34, 1 }
 0x103   : > { %v259_v36 = vadd.f32 %v258_v35, %v257_v34 }
 0x105   : > { %2306 = vpush %v259_v36 }
 0x136   : > { %s2307_s26 = spop %2306 }
 0x137   : > { %s262_s5 = smul.f32 0.15, %s2307_s26  ;;  %s3281_s26 = scalar_lea.hbm %s3335_s3, %s2308_s18 }
 0x139   : > { %s263_s10 = smul.f32 0.00390625, %s262_s5  ;;  %s2460_s5 = scalar_lea.vmem %s3283_s20, 21504 }
 0x13a   : > { %p2461_p6 = scmp.ne.s32.totalorder %s3283_s20, %s2460_s5 }
 0x13b   : > { %s266_s11 = sshrl.u32 %s263_s10, 16  ;;  %p265_p4 = scmp.ne.f32.partialorder %s263_s10, %s263_s10 }
 0x13c   : > { %s267_s27 = sand.u32 1, %s266_s11  ;;  %p2462_p8 = pnand %p2461_p6, %p2657_p12 }
 0x13d   : > { %s268_s28 = sadd.s32 32767, %s267_s27 }
 0x13e   : > { %s269_s29 = sadd.s32 %s268_s28, %s263_s10  ;;  %p2463_p10 = pneg %p2462_p8 }
 0x13f   : > { %s270_s23 = sand.u32 4294901760, %s269_s29  ;;  %s2543_s10 = smov [#allocation8]  }
 0x140   : > { %s3357_s23 = smov (%p265_p4, %s270_s23), 2143289344  ;;  %s2464_s11 = sshll.u32 %s2543_s10, 4  ;;  %s2465_s11 = int_to_ptr.vmem [resolvable:$false] %s2464_s11 }
 0x141   : > { %s273_s30 = sshrl.u32 %s3357_s23, 16  ;;  %s2466_s27 = scalar_lea.vmem %s2465_s11, 43008 }
 0x142   : > { %s275_s25 = sshll.u32 %s273_s30, 16  ;;  %p2467_p13 = scmp.lt.s32.totalorder %s3283_s20, %s2465_s11 }
 0x143   : > { %s276_s7 = sor.u32 %s275_s25, %s273_s30  ;;  %p2468_p3 = scmp.lt.s32.totalorder %s2466_s27, %s2460_s5 }
 0x144   : > { %v277_v43 = vstv %s276_s7 }
 0x145   : > { %v279_v44 = vadd.bf16 %v277_v43, %v274_v41  ;;  %v283_v45 = vadd.bf16 %v282_v42, %v277_v43  ;;  %v287_v46 = vadd.bf16 %v286_v40, %v277_v43  ;;  %p2469_p7 = por %p2468_p3, %p2467_p13 }
 0x147   : > { %v280_v47 = vmax.bf16 %v2538_v0, %v279_v44  ;;  %v284_v48 = vmax.bf16 %v2538_v0, %v283_v45  ;;  %v288_v49 = vmax.bf16 %v2538_v0, %v287_v46  ;;  %p2470_p9 = pnand %p2469_p7, %p2463_p10 }
 0x149   : > { %v281_v50 = vmin.bf16 %v2539_v16, %v280_v47  ;;  %v285_v51 = vmin.bf16 %v2539_v16, %v284_v48  ;;  %v289_v52 = vmin.bf16 %v2539_v16, %v288_v49  ;;  %v2540_v49 = vmov 1077952576  }
 0x14b   : > { %v290_v53 = vmul.bf16 1050230425, %v281_v50  ;;  %v291_v54 = vmul.bf16 1058422550, %v285_v51  ;;  %v293_v56 = vmul.bf16 1038695913, %v289_v52 }
 0x14c   : > { %v296_v58 = vmul.bf16 1067073434, %v281_v50  ;;  %v300_v60 = vmul.bf16 1067073434, %v285_v51  ;;  %v304_v61 = vmul.bf16 1067073434, %v289_v52 }
 0x14d   : > { %v292_v55 = vadd.bf16 %v291_v54, %v290_v53  ;;  %v2541_v51 = vmov 1073758208   ;;  %v2542_v53 = vmov 1082146944  }
 0x14f   : > { %v294_v57 = vadd.bf16 %v293_v56, %v292_v55 }
 0x151   : > { %v295_v59 = vmul.bf16 3192766029, %v294_v57 }
 0x153   : > { %v297_v62 = vadd.bf16 %v296_v58, %v295_v59  ;;  %v301_v63 = vadd.bf16 %v300_v60, %v295_v59  ;;  %v305_v1 = vadd.bf16 %v304_v61, %v295_v59 }
 0x155   : > { %v298_v2 = vmax.bf16 %v2538_v0, %v297_v62  ;;  %v302_v3 = vmax.bf16 %v2538_v0, %v301_v63  ;;  %v306_v4 = vmax.bf16 %v2538_v0, %v305_v1 }
 0x157   : > { %v299_v5 = vmin.bf16 %v2539_v16, %v298_v2  ;;  %v303_v6 = vmin.bf16 %v2539_v16, %v302_v3  ;;  %v307_v7 = vmin.bf16 %v2539_v16, %v306_v4 }
 0x159   : > { %v308_v8 = vmax.bf16 %v303_v6, %v299_v5  ;;  %v310_v9 = vmin.bf16 %v303_v6, %v299_v5 }
 0x15b   : > { %v2754_v10 = vmax.bf16 %v308_v8, %v307_v7  ;;  %v311_v11 = vmin.bf16 %v310_v9, %v307_v7 }
 0x15d   : > { %vm312_vm1 = vcmp.eq.bf16.partialorder %v2754_v10, %v311_v11  ;;  %v313_v12 = vsub.bf16 %v2754_v10, %v311_v11  ;;  %v327_v20 = vsub.bf16 %v2754_v10, %v299_v5  ;;  %v329_v21 = vsub.bf16 %v2754_v10, %v303_v6 }
 0x15e   : > { %v331_v22 = vsub.bf16 %v2754_v10, %v307_v7  ;;  %v314_v26 = vsel %vm312_vm1, 1065369472, %v2754_v10  ;;  %vm336_vm2 = vcmp.eq.bf16.partialorder %v2754_v10, %v303_v6  ;;  %vm337_vm3 = vcmp.ne.bf16.partialorder %v2754_v10, %v299_v5 }
 0x15f   : > { %v321_v13 = vsel %vm312_vm1, 1065369472, %v313_v12  ;;  %vm342_vm4 = vcmp.ne.bf16.partialorder %v2754_v10, %v303_v6  ;;  %v315_v32 = vunpack.c.l.bf16 %v314_v26  ;;  %vm333_vm5 = vcmp.eq.bf16.partialorder %v2754_v10, %v299_v5  ;;  %vm338_vm6 = vmand %vm336_vm2, %vm337_vm3 }
 0x160   : > { %v322_v14 = vunpack.c.l.bf16 %v321_v13  ;;  %v323_v15 = vunpack.c.h.bf16 %v321_v13  ;;  %v316_v33 = vunpack.c.h.bf16 %v314_v26  ;;  %vm343_vm7 = vmand %vm342_vm4, %vm337_vm3  ;;  %v2812_v26 = vld [vmem:[#allocation6 + $0x40] sm:$0xff]  }
 0x162   : > { %2394 = vrcp.f32 %v322_v14 }
 0x163   : > { %2396 = vrcp.f32 %v323_v15 }
 0x164   : > { %2398 = vrcp.f32 %v315_v32 }
 0x165   : > { %2400 = vrcp.f32 %v316_v33 }
 0x16c   : > { %v2395_v17 = vpop.eup %2394 }
 0x16d   : > { %v2397_v18 = vpop.eup %2396 }
 0x16e   : > { %v326_v19 = vpack.c.bf16 %v2397_v18, %v2395_v17  ;;  %v2399_v46 = vpop.eup %2398 }
 0x16f   : > { %v2401_v48 = vpop.eup %2400 }
 0x170   : > { %v328_v23 = vmul.bf16 %v327_v20, %v326_v19  ;;  %v330_v24 = vmul.bf16 %v329_v21, %v326_v19  ;;  %v332_v25 = vmul.bf16 %v331_v22, %v326_v19  ;;  %v319_v55 = vpack.c.bf16 %v2401_v48, %v2399_v46  ;;  %v2784_v19 = vld [vmem:[#allocation6 + $0x8] sm:$0xff]   ;;  %v2786_v20 = vld [vmem:[#allocation6 + $0x10] sm:$0xff]   ;;  %v2794_v21 = vld [vmem:[#allocation6 + $0x18] sm:$0xff]  }
 0x171   : > { %v2796_v22 = vld [vmem:[#allocation6 + $0x20] sm:$0xff]  }
 0x172   : > { %v334_v27 = vsub.bf16 %v332_v25, %v330_v24  ;;  %v339_v28 = vadd.bf16 1073758208, %v328_v23  ;;  %v344_v29 = vadd.bf16 1082146944, %v330_v24  ;;  %v320_v62 = vmul.bf16 %v319_v55, %v313_v12  ;;  %v2804_v24 = vld [vmem:[#allocation6 + $0x30] sm:$0xff]  }
 0x174   : > { %v340_v30 = vsub.bf16 %v339_v28, %v332_v25  ;;  %v345_v31 = vsub.bf16 %v344_v29, %v328_v23  ;;  %v335_v34 = vsel %vm333_vm5, %v334_v27, 0  ;;  %v354_v6 = vmul.bf16 %v320_v62, %v2754_v10  ;;  %v2802_v23 = vld [vmem:[#allocation6 + $0x28] sm:$0xff]   ;;  %v2810_v25 = vld [vmem:[#allocation6 + $0x38] sm:$0xff]   ;;  %v2820_v28 = vld [vmem:[#allocation6 + $0x50] sm:$0xff]  }
 0x175   : > { %v2818_v27 = vld [vmem:[#allocation6 + $0x48] sm:$0xff]   ;;  %v2826_v29 = vld [vmem:[#allocation6 + $0x58] sm:$0xff]  }
 0x176   : > { %v341_v35 = vsel %vm338_vm6, %v340_v30, 0  ;;  %v346_v40 = vsel %vm343_vm7, %v345_v31, 0  ;;  %v2828_v30 = vld [vmem:[#allocation6 + $0x60] sm:$0xff]   ;;  %v2834_v31 = vld [vmem:[#allocation6 + $0x68] sm:$0xff]  }
 0x177   : > { %v347_v36 = vadd.bf16 %v341_v35, %v335_v34 }
 0x179   : > { %v348_v41 = vadd.bf16 %v347_v36, %v346_v40 }
 0x17b   : > { %v349_v42 = vmul.bf16 1043021355, %v348_v41 }
 0x17d   : > { %v350_v43 = vadd.bf16 1028472141, %v349_v42 }
 0x17f   : > { %v351_v44 = vfloor.bf16 %v350_v43 }
 0x181   : > { %v352_v45 = vsub.bf16 %v350_v43, %v351_v44 }
 0x183   : > { %v353_v47 = vmul.bf16 1086341312, %v352_v45 }
 0x185   : > { %v355_v50 = vsub.bf16 %v353_v47, %v2540_v49  ;;  %v363_v52 = vsub.bf16 %v353_v47, %v2541_v51  ;;  %v371_v54 = vsub.bf16 %v353_v47, %v2542_v53 }
 0x187   : > { %v356_v56 = vand.u32 2147450879, %v355_v50  ;;  %v364_v57 = vand.u32 2147450879, %v363_v52  ;;  %v372_v58 = vand.u32 2147450879, %v371_v54 }
 0x189   : > { %v357_v59 = vsub.bf16 %v356_v56, %v2539_v16  ;;  %v365_v60 = vsub.bf16 1073758208, %v364_v57  ;;  %v373_v61 = vsub.bf16 1073758208, %v372_v58 }
 0x18b   : > { %v358_v63 = vmax.bf16 %v2538_v0, %v357_v59  ;;  %v366_v1 = vmax.bf16 %v2538_v0, %v365_v60  ;;  %v374_v2 = vmax.bf16 %v2538_v0, %v373_v61 }
 0x18d   : > { %v359_v3 = vmin.bf16 %v2539_v16, %v358_v63  ;;  %v367_v4 = vmin.bf16 %v2539_v16, %v366_v1  ;;  %v375_v5 = vmin.bf16 %v2539_v16, %v374_v2 }
 0x18f   : > { %v360_v7 = vsub.bf16 1065369472, %v359_v3  ;;  %v368_v8 = vsub.bf16 1065369472, %v367_v4  ;;  %v376_v9 = vsub.bf16 1065369472, %v375_v5 }
 0x191   : > { %v361_v11 = vmul.bf16 %v360_v7, %v354_v6  ;;  %v369_v13 = vmul.bf16 %v368_v8, %v354_v6  ;;  %v377_v12 = vmul.bf16 %v376_v9, %v354_v6 }
 0x193   : > { %v362_v14 = vsub.bf16 %v2754_v10, %v361_v11  ;;  %v378_v15 = vsub.bf16 %v2754_v10, %v377_v12  ;;  %v370_v17 = vsub.bf16 %v2754_v10, %v369_v13 }
 0x195   : > { %379 = vst.msk [vmem:[#allocation2] sm:$0xff] %vm248_vm0, %v362_v14  ;;  %387 = vst.msk [vmem:[#allocation2 + $0x10] sm:$0xff] %vm248_vm0, %v378_v15 }
 0x196   : > { %383 = vst.msk [vmem:[#allocation2 + $0x8] sm:$0xff] %vm248_vm0, %v370_v17 }
 0x19c   : > { %v418_v16 = vld [vmem:[#allocation2] sm:$0xff]  ;;  %v1406_v18 = vld [vmem:[#allocation2 + $0x10] sm:$0xff] }
 0x19d   : > { %2210 = vmatprep.subr.bf16.mxu0 %v418_v16  ;;  %2270 = vmatprep.subr.bf16.mxu1 %v1406_v18  ;;  %v973_v10 = vld [vmem:[#allocation2 + $0x8] sm:$0xff] }
 0x19e   : > { %2211 = vmatpush3.bf16.msra.mxu0 %v418_v16 }
 0x19f   : > { %742 = vmatprep.subr.bf16.mxu0 %v2729_v37 }
 0x1a1   : > { %2213 = vmatmul.mubr.msk.bf16.vlgmr.msra.gmra.mrb[0].mxu0 %vm248_vm0, %v2784_v19 }
 0x1a2   : > { %743 = vmatpush1.bf16.msra.mxu0 %v2734_v38  ;;  %2216 = vmatprep.mubr.msk.bf16.mxu0 %vm248_vm0, %v2786_v20 }
 0x1a3   : > { %2240 = vmatprep.subr.bf16.mxu0 %v973_v10 }
 0x1a9   : > { %2217 = vmatmul.mubr.msk.bf16.gmra.mrb[4].mxu0 %vm248_vm0, %v2794_v21 }
 0x1aa   : > { %2220 = vmatprep.mubr.msk.bf16.mxu0 %vm248_vm0, %v2796_v22 }
 0x1b1   : > { %2221 = vmatmul.mubr.msk.bf16.gmra.mrb[8].mxu0 %vm248_vm0, %v2802_v23 }
 0x1b2   : > { %2224 = vmatprep.mubr.msk.bf16.mxu0 %vm248_vm0, %v2804_v24 }
 0x1b9   : > { %2225 = vmatmul.mubr.msk.bf16.gmra.mrb[12].mxu0 %vm248_vm0, %v2810_v25 }
 0x1ba   : > { %2228 = vmatprep.mubr.msk.bf16.mxu0 %vm248_vm0, %v2812_v26 }
 0x1c1   : > { %2229 = vmatmul.mubr.msk.bf16.gmra.mrb[16].mxu0 %vm248_vm0, %v2818_v27 }
 0x1c2   : > { %2232 = vmatprep.mubr.msk.bf16.mxu0 %vm248_vm0, %v2820_v28 }
 0x1c9   : > { %2233 = vmatmul.mubr.msk.bf16.gmra.mrb[20].mxu0 %vm248_vm0, %v2826_v29 }
 0x1ca   : > { %2236 = vmatprep.mubr.msk.bf16.mxu0 %vm248_vm0, %v2828_v30 }
 0x1d1   : > { %2237 = vmatmul.mubr.msk.bf16.gmra.mrb[24].mxu0 %vm248_vm0, %v2834_v31 }
 0x1d2   : > { %774 = vmatprep.mubr.bf16.mxu0 %v2538_v0 }
 0x274   : > { %v2214_v32 = vpop.f32.mrb[0].mxu0 }
 0x275   : > { %v565_v33 = vpop.f32.mrb[1].mxu0 }
 0x276   : > { %v2215_v34 = vpop.f32.mrb[2].mxu0 }
 0x277   : > { %v677_v35 = vpack.c.bf16 %v2215_v34, %v2214_v32  ;;  %v568_v36 = vpop.f32.mrb[3].mxu0 }
 0x278   : > { %v676_v40 = vpack.c.bf16 %v568_v36, %v565_v33 }
 0x27a   : > { %1980 = vmatmul.mubr.msk.bf16.vlgmr.msra.gmra.mrb[28].mxu0 %vm248_vm0, %v676_v40 }
 0x27b   : > { %2241 = vmatpush3.bf16.msra.mxu0 %v973_v10  ;;  %784 = vmatprep.mubr.bf16.mxu0 %v2538_v0 }
 0x27c   : > { %v2218_v41 = vpop.f32.mrb[4].mxu0  ;;  %1175 = vmatprep.subr.bf16.mxu0 %v2729_v37 }
 0x27d   : > { %v581_v42 = vpop.f32.mrb[5].mxu0 }
 0x27e   : > { %v2219_v43 = vpop.f32.mrb[6].mxu0 }
 0x27f   : > { %v679_v44 = vpack.c.bf16 %v2219_v43, %v2218_v41  ;;  %v584_v45 = vpop.f32.mrb[7].mxu0 }
 0x280   : > { %v678_v46 = vpack.c.bf16 %v584_v45, %v581_v42 }
 0x281   : > { %1983 = vmatmul.mubr.msk.bf16.vlgmr.msra.gmra.mrb[0].mxu1 %vm248_vm0, %v679_v44 }
 0x282   : > { %2271 = vmatpush3.bf16.msra.mxu1 %v1406_v18  ;;  %1981 = vmatmul.mubr.msk.bf16.gmra.mrb[32].mxu0 %vm248_vm0, %v677_v35 }
 0x283   : > { %794 = vmatprep.mubr.bf16.mxu0 %v2538_v0  ;;  %814 = vmatprep.mubr.bf16.mxu1 %v2538_v0 }
 0x284   : > { %v2222_v47 = vpop.f32.mrb[8].mxu0  ;;  %1608 = vmatprep.subr.bf16.mxu1 %v2729_v37 }
 0x285   : > { %v597_v48 = vpop.f32.mrb[9].mxu0 }
 0x286   : > { %v2223_v49 = vpop.f32.mrb[10].mxu0 }
 0x287   : > { %v681_v50 = vpack.c.bf16 %v2223_v49, %v2222_v47  ;;  %v600_v51 = vpop.f32.mrb[11].mxu0 }
 0x288   : > { %v680_v52 = vpack.c.bf16 %v600_v51, %v597_v48 }
 0x28a   : > { %1982 = vmatmul.mubr.msk.bf16.gmra.mrb[36].mxu0 %vm248_vm0, %v678_v46  ;;  %1984 = vmatmul.mubr.msk.bf16.gmra.mrb[4].mxu1 %vm248_vm0, %v680_v52 }
 0x28b   : > { %824 = vmatprep.mubr.bf16.mxu1 %v2538_v0  ;;  %2242 = vmatprep.mubr.msk.bf16.mxu0 %vm248_vm0, %v2738_v39 }
 0x28c   : > { %v2226_v53 = vpop.f32.mrb[12].mxu0 }
 0x28d   : > { %v613_v54 = vpop.f32.mrb[13].mxu0 }
 0x28e   : > { %v2227_v55 = vpop.f32.mrb[14].mxu0 }
 0x28f   : > { %v683_v56 = vpack.c.bf16 %v2227_v55, %v2226_v53  ;;  %v616_v57 = vpop.f32.mrb[15].mxu0 }
 0x290   : > { %v682_v37 = vpack.c.bf16 %v616_v57, %v613_v54 }
 0x292   : > { %1985 = vmatmul.mubr.msk.bf16.gmra.mrb[8].mxu1 %vm248_vm0, %v681_v50  ;;  %2243 = vmatmul.mubr.msk.bf16.vlgmr.msra.gmra.mrb[40].mxu0 %vm248_vm0, %v2784_v19 }
 0x293   : > { %834 = vmatprep.mubr.bf16.mxu1 %v2538_v0  ;;  %2246 = vmatprep.mubr.msk.bf16.mxu0 %vm248_vm0, %v2786_v20 }
 0x294   : > { %v2230_v58 = vpop.f32.mrb[16].mxu0  ;;  %1176 = vmatpush1.bf16.msra.mxu0 %v2734_v38 }
 0x295   : > { %v629_v59 = vpop.f32.mrb[17].mxu0 }
 0x296   : > { %v2231_v60 = vpop.f32.mrb[18].mxu0 }
 0x297   : > { %v685_v61 = vpack.c.bf16 %v2231_v60, %v2230_v58  ;;  %v632_v62 = vpop.f32.mrb[19].mxu0 }
 0x298   : > { %v684_v63 = vpack.c.bf16 %v632_v62, %v629_v59 }
 0x29a   : > { %1986 = vmatmul.mubr.msk.bf16.gmra.mrb[12].mxu1 %vm248_vm0, %v682_v37  ;;  %2247 = vmatmul.mubr.msk.bf16.gmra.mrb[44].mxu0 %vm248_vm0, %v2794_v21 }
 0x29b   : > { %844 = vmatprep.mubr.bf16.mxu1 %v2538_v0  ;;  %2250 = vmatprep.mubr.msk.bf16.mxu0 %vm248_vm0, %v2796_v22 }
 0x29c   : > { %v2234_v1 = vpop.f32.mrb[20].mxu0 }
 0x29d   : > { %v645_v2 = vpop.f32.mrb[21].mxu0 }
 0x29e   : > { %v2235_v3 = vpop.f32.mrb[22].mxu0 }
 0x29f   : > { %v687_v4 = vpack.c.bf16 %v2235_v3, %v2234_v1  ;;  %v648_v5 = vpop.f32.mrb[23].mxu0 }
 0x2a0   : > { %v686_v6 = vpack.c.bf16 %v648_v5, %v645_v2 }
 0x2a2   : > { %1987 = vmatmul.mubr.msk.bf16.gmra.mrb[16].mxu1 %vm248_vm0, %v683_v56  ;;  %2251 = vmatmul.mubr.msk.bf16.gmra.mrb[48].mxu0 %vm248_vm0, %v2802_v23 }
 0x2a3   : > { %854 = vmatprep.mubr.bf16.mxu1 %v2538_v0  ;;  %2254 = vmatprep.mubr.msk.bf16.mxu0 %vm248_vm0, %v2804_v24 }
 0x2a4   : > { %v2238_v7 = vpop.f32.mrb[24].mxu0 }
 0x2a5   : > { %v661_v8 = vpop.f32.mrb[25].mxu0 }
 0x2a6   : > { %v2239_v9 = vpop.f32.mrb[26].mxu0 }
 0x2a7   : > { %v689_v11 = vpack.c.bf16 %v2239_v9, %v2238_v7  ;;  %v664_v13 = vpop.f32.mrb[27].mxu0 }
 0x2a8   : > { %v688_v12 = vpack.c.bf16 %v664_v13, %v661_v8 }
 0x2aa   : > { %1988 = vmatmul.mubr.msk.bf16.gmra.mrb[20].mxu1 %vm248_vm0, %v684_v63  ;;  %2255 = vmatmul.mubr.msk.bf16.gmra.mrb[52].mxu0 %vm248_vm0, %v2810_v25 }
 0x2ab   : > { %864 = vmatprep.mubr.bf16.mxu1 %v2538_v0  ;;  %2258 = vmatprep.mubr.msk.bf16.mxu0 %vm248_vm0, %v2812_v26 }
 0x2b2   : > { %1989 = vmatmul.mubr.msk.bf16.gmra.mrb[24].mxu1 %vm248_vm0, %v685_v61  ;;  %2259 = vmatmul.mubr.msk.bf16.gmra.mrb[56].mxu0 %vm248_vm0, %v2818_v27 }
 0x2b3   : > { %874 = vmatprep.mubr.bf16.mxu1 %v2538_v0  ;;  %2262 = vmatprep.mubr.msk.bf16.mxu0 %vm248_vm0, %v2820_v28 }
 0x2ba   : > { %1990 = vmatmul.mubr.msk.bf16.gmra.mrb[28].mxu1 %vm248_vm0, %v686_v6  ;;  %2263 = vmatmul.mubr.msk.bf16.gmra.mrb[60].mxu0 %vm248_vm0, %v2826_v29 }
 0x2bb   : > { %884 = vmatprep.mubr.bf16.mxu1 %v2538_v0  ;;  %2266 = vmatprep.mubr.msk.bf16.mxu0 %vm248_vm0, %v2828_v30 }
 0x2c2   : > { %1991 = vmatmul.mubr.msk.bf16.gmra.mrb[32].mxu1 %vm248_vm0, %v687_v4  ;;  %2267 = vmatmul.mubr.msk.bf16.gmra.mrb[64].mxu0 %vm248_vm0, %v2834_v31 }
 0x2c3   : > { %894 = vmatprep.mubr.bf16.mxu1 %v2538_v0  ;;  %1207 = vmatprep.mubr.bf16.mxu0 %v2538_v0 }
 0x2ca   : > { %1992 = vmatmul.mubr.msk.bf16.gmra.mrb[36].mxu1 %vm248_vm0, %v688_v12 }
 0x2cb   : > { %904 = vmatprep.mubr.bf16.mxu1 %v2538_v0 }
 0x2d2   : > { %1993 = vmatmul.mubr.msk.bf16.gmra.mrb[40].mxu1 %vm248_vm0, %v689_v11 }
 0x2d3   : > { %2272 = vmatprep.mubr.msk.bf16.mxu1 %vm248_vm0, %v2738_v39 }
 0x2da   : > { %2273 = vmatmul.mubr.msk.bf16.vlgmr.msra.gmra.mrb[44].mxu1 %vm248_vm0, %v2784_v19 }
 0x2db   : > { %2276 = vmatprep.mubr.msk.bf16.mxu1 %vm248_vm0, %v2786_v20  ;;  %1609 = vmatpush1.bf16.msra.mxu1 %v2734_v38 }
 0x2e2   : > { %2277 = vmatmul.mubr.msk.bf16.gmra.mrb[48].mxu1 %vm248_vm0, %v2794_v21 }
 0x2e3   : > { %2280 = vmatprep.mubr.msk.bf16.mxu1 %vm248_vm0, %v2796_v22 }
 0x2ea   : > { %2281 = vmatmul.mubr.msk.bf16.gmra.mrb[52].mxu1 %vm248_vm0, %v2802_v23 }
 0x2eb   : > { %2284 = vmatprep.mubr.msk.bf16.mxu1 %vm248_vm0, %v2804_v24 }
 0x2f2   : > { %2285 = vmatmul.mubr.msk.bf16.gmra.mrb[56].mxu1 %vm248_vm0, %v2810_v25 }
 0x2f3   : > { %2288 = vmatprep.mubr.msk.bf16.mxu1 %vm248_vm0, %v2812_v26 }
 0x2fa   : > { %2289 = vmatmul.mubr.msk.bf16.gmra.mrb[60].mxu1 %vm248_vm0, %v2818_v27 }
 0x2fb   : > { %2292 = vmatprep.mubr.msk.bf16.mxu1 %vm248_vm0, %v2820_v28 }
 0x302   : > { %2293 = vmatmul.mubr.msk.bf16.gmra.mrb[64].mxu1 %vm248_vm0, %v2826_v29 }
 0x303   : > { %2296 = vmatprep.mubr.msk.bf16.mxu1 %vm248_vm0, %v2828_v30 }
 0x30a   : > { %2297 = vmatmul.mubr.msk.bf16.gmra.mrb[68].mxu1 %vm248_vm0, %v2834_v31 }
 0x30b   : > { %1640 = vmatprep.mubr.bf16.mxu1 %v2538_v0 }
 0x34d   : > { %v776_v38 = vpop.f32.mrb[28].mxu0 }
 0x34e   : > { %915 = vst [vmem:[%s2928_s9] sm:$0xff] %v776_v38  ;;  %v778_v39 = vpop.f32.mrb[29].mxu0 }
 0x34f   : > { %917 = vst.msk [vmem:[%s2928_s9 + $0x8] sm:$0xff] %vm916_vm8, %v778_v39  ;;  %v780_v14 = vpop.f32.mrb[30].mxu0 }
 0x350   : > { %918 = vst [vmem:[%s2928_s9 + $0x10] sm:$0xff] %v780_v14  ;;  %v782_v15 = vpop.f32.mrb[31].mxu0 }
 0x351   : > { %919 = vst.msk [vmem:[%s2928_s9 + $0x18] sm:$0xff] %vm916_vm8, %v782_v15 }
 0x354   : > { %v806_v17 = vpop.f32.mrb[0].mxu1 }
 0x355   : > { %928 = vst [vmem:[%s2928_s9 + $0x60] sm:$0xff] %v806_v17  ;;  %v786_v16 = vpop.f32.mrb[32].mxu0  ;;  %v808_v18 = vpop.f32.mrb[1].mxu1 }
 0x356   : > { %920 = vst [vmem:[%s2928_s9 + $0x20] sm:$0xff] %v786_v16  ;;  %929 = vst.msk [vmem:[%s2928_s9 + $0x68] sm:$0xff] %vm916_vm8, %v808_v18  ;;  %v788_v19 = vpop.f32.mrb[33].mxu0  ;;  %v810_v20 = vpop.f32.mrb[2].mxu1 }
 0x357   : > { %921 = vst.msk [vmem:[%s2928_s9 + $0x28] sm:$0xff] %vm916_vm8, %v788_v19  ;;  %930 = vst [vmem:[%s2928_s9 + $0x70] sm:$0xff] %v810_v20  ;;  %v790_v10 = vpop.f32.mrb[34].mxu0  ;;  %v812_v21 = vpop.f32.mrb[3].mxu1 }
 0x358   : > { %922 = vst [vmem:[%s2928_s9 + $0x30] sm:$0xff] %v790_v10  ;;  %931 = vst.msk [vmem:[%s2928_s9 + $0x78] sm:$0xff] %vm916_vm8, %v812_v21  ;;  %v792_v22 = vpop.f32.mrb[35].mxu0 }
 0x359   : > { %923 = vst.msk [vmem:[%s2928_s9 + $0x38] sm:$0xff] %vm916_vm8, %v792_v22 }
 0x35d   : > { %v796_v23 = vpop.f32.mrb[36].mxu0  ;;  %v816_v24 = vpop.f32.mrb[4].mxu1 }
 0x35e   : > { %924 = vst [vmem:[%s2928_s9 + $0x40] sm:$0xff] %v796_v23  ;;  %932 = vst [vmem:[%s2928_s9 + $0x80] sm:$0xff] %v816_v24  ;;  %v798_v25 = vpop.f32.mrb[37].mxu0  ;;  %v818_v26 = vpop.f32.mrb[5].mxu1 }
 0x35f   : > { %925 = vst.msk [vmem:[%s2928_s9 + $0x48] sm:$0xff] %vm916_vm8, %v798_v25  ;;  %933 = vst.msk [vmem:[%s2928_s9 + $0x88] sm:$0xff] %vm916_vm8, %v818_v26  ;;  %v800_v27 = vpop.f32.mrb[38].mxu0  ;;  %v820_v28 = vpop.f32.mrb[6].mxu1 }
 0x360   : > { %926 = vst [vmem:[%s2928_s9 + $0x50] sm:$0xff] %v800_v27  ;;  %934 = vst [vmem:[%s2928_s9 + $0x90] sm:$0xff] %v820_v28  ;;  %v802_v29 = vpop.f32.mrb[39].mxu0  ;;  %v822_v30 = vpop.f32.mrb[7].mxu1 }
 0x361   : > { %927 = vst.msk [vmem:[%s2928_s9 + $0x58] sm:$0xff] %vm916_vm8, %v802_v29  ;;  %935 = vst.msk [vmem:[%s2928_s9 + $0x98] sm:$0xff] %vm916_vm8, %v822_v30 }
 0x365   : > { %v826_v31 = vpop.f32.mrb[8].mxu1  ;;  %v2244_v32 = vpop.f32.mrb[40].mxu0 }
 0x366   : > { %936 = vst [vmem:[%s2928_s9 + $0xa0] sm:$0xff] %v826_v31  ;;  %v828_v33 = vpop.f32.mrb[9].mxu1  ;;  %v1008_v34 = vpop.f32.mrb[41].mxu0 }
 0x367   : > { %937 = vst.msk [vmem:[%s2928_s9 + $0xa8] sm:$0xff] %vm916_vm8, %v828_v33  ;;  %v830_v35 = vpop.f32.mrb[10].mxu1  ;;  %v2245_v36 = vpop.f32.mrb[42].mxu0 }
 0x368   : > { %938 = vst [vmem:[%s2928_s9 + $0xb0] sm:$0xff] %v830_v35  ;;  %v832_v40 = vpop.f32.mrb[11].mxu1  ;;  %v1120_v41 = vpack.c.bf16 %v2245_v36, %v2244_v32  ;;  %v1011_v42 = vpop.f32.mrb[43].mxu0 }
 0x369   : > { %939 = vst.msk [vmem:[%s2928_s9 + $0xb8] sm:$0xff] %vm916_vm8, %v832_v40  ;;  %v1119_v43 = vpack.c.bf16 %v1011_v42, %v1008_v34 }
 0x36b   : > { %2008 = vmatmul.mubr.msk.bf16.vlgmr.msra.gmra.mrb[68].mxu0 %vm248_vm0, %v1119_v43 }
 0x36c   : > { %1217 = vmatprep.mubr.bf16.mxu0 %v2538_v0 }
 0x36d   : > { %v836_v44 = vpop.f32.mrb[12].mxu1  ;;  %v2248_v45 = vpop.f32.mrb[44].mxu0 }
 0x36e   : > { %940 = vst [vmem:[%s2928_s9 + $0xc0] sm:$0xff] %v836_v44  ;;  %v838_v46 = vpop.f32.mrb[13].mxu1  ;;  %v1024_v47 = vpop.f32.mrb[45].mxu0 }
 0x36f   : > { %941 = vst.msk [vmem:[%s2928_s9 + $0xc8] sm:$0xff] %vm916_vm8, %v838_v46  ;;  %v840_v48 = vpop.f32.mrb[14].mxu1  ;;  %v2249_v49 = vpop.f32.mrb[46].mxu0 }
 0x370   : > { %942 = vst [vmem:[%s2928_s9 + $0xd0] sm:$0xff] %v840_v48  ;;  %v842_v50 = vpop.f32.mrb[15].mxu1  ;;  %v1122_v51 = vpack.c.bf16 %v2249_v49, %v2248_v45  ;;  %v1027_v52 = vpop.f32.mrb[47].mxu0 }
 0x371   : > { %943 = vst.msk [vmem:[%s2928_s9 + $0xd8] sm:$0xff] %vm916_vm8, %v842_v50  ;;  %v1121_v53 = vpack.c.bf16 %v1027_v52, %v1024_v47 }
 0x373   : > { %2009 = vmatmul.mubr.msk.bf16.gmra.mrb[72].mxu0 %vm248_vm0, %v1120_v41 }
 0x374   : > { %1227 = vmatprep.mubr.bf16.mxu0 %v2538_v0 }
 0x375   : > { %v846_v54 = vpop.f32.mrb[16].mxu1  ;;  %v2252_v55 = vpop.f32.mrb[48].mxu0 }
 0x376   : > { %944 = vst [vmem:[%s2928_s9 + $0xe0] sm:$0xff] %v846_v54  ;;  %v848_v56 = vpop.f32.mrb[17].mxu1  ;;  %v1040_v57 = vpop.f32.mrb[49].mxu0 }
 0x377   : > { %945 = vst.msk [vmem:[%s2928_s9 + $0xe8] sm:$0xff] %vm916_vm8, %v848_v56  ;;  %v850_v37 = vpop.f32.mrb[18].mxu1  ;;  %v2253_v58 = vpop.f32.mrb[50].mxu0 }
 0x378   : > { %946 = vst [vmem:[%s2928_s9 + $0xf0] sm:$0xff] %v850_v37  ;;  %v852_v59 = vpop.f32.mrb[19].mxu1  ;;  %v1124_v60 = vpack.c.bf16 %v2253_v58, %v2252_v55  ;;  %v1043_v61 = vpop.f32.mrb[51].mxu0 }
 0x379   : > { %947 = vst.msk [vmem:[%s2928_s9 + $0xf8] sm:$0xff] %vm916_vm8, %v852_v59  ;;  %v1123_v62 = vpack.c.bf16 %v1043_v61, %v1040_v57 }
 0x37b   : > { %2010 = vmatmul.mubr.msk.bf16.gmra.mrb[76].mxu0 %vm248_vm0, %v1121_v53 }
 0x37c   : > { %1237 = vmatprep.mubr.bf16.mxu0 %v2538_v0 }
 0x37d   : > { %v856_v63 = vpop.f32.mrb[20].mxu1  ;;  %v2984_v1 = vpop.f32.mrb[52].mxu0 }
 0x37e   : > { %948 = vst [vmem:[%s2928_s9 + $0x100] sm:$0xff] %v856_v63  ;;  %v858_v2 = vpop.f32.mrb[21].mxu1  ;;  %v1056_v3 = vpop.f32.mrb[53].mxu0 }
 0x37f   : > { %949 = vst.msk [vmem:[%s2928_s9 + $0x108] sm:$0xff] %vm916_vm8, %v858_v2  ;;  %v860_v4 = vpop.f32.mrb[22].mxu1  ;;  %v2989_v5 = vpop.f32.mrb[54].mxu0 }
 0x380   : > { %950 = vst [vmem:[%s2928_s9 + $0x110] sm:$0xff] %v860_v4  ;;  %v862_v6 = vpop.f32.mrb[23].mxu1  ;;  %v1126_v7 = vpack.c.bf16 %v2989_v5, %v2984_v1  ;;  %v1059_v8 = vpop.f32.mrb[55].mxu0 }
 0x381   : > { %951 = vst.msk [vmem:[%s2928_s9 + $0x118] sm:$0xff] %vm916_vm8, %v862_v6  ;;  %v1125_v9 = vpack.c.bf16 %v1059_v8, %v1056_v3 }
 0x383   : > { %2011 = vmatmul.mubr.msk.bf16.gmra.mrb[80].mxu0 %vm248_vm0, %v1122_v51 }
 0x384   : > { %1247 = vmatprep.mubr.bf16.mxu0 %v2538_v0 }
 0x385   : > { %v866_v11 = vpop.f32.mrb[24].mxu1  ;;  %v2998_v13 = vpop.f32.mrb[56].mxu0 }
 0x386   : > { %952 = vst [vmem:[%s2928_s9 + $0x120] sm:$0xff] %v866_v11  ;;  %v868_v12 = vpop.f32.mrb[25].mxu1  ;;  %v3001_v38 = vpop.f32.mrb[57].mxu0 }
 0x387   : > { %953 = vst.msk [vmem:[%s2928_s9 + $0x128] sm:$0xff] %vm916_vm8, %v868_v12  ;;  %v870_v39 = vpop.f32.mrb[26].mxu1  ;;  %v3005_v14 = vpop.f32.mrb[58].mxu0 }
 0x388   : > { %954 = vst [vmem:[%s2928_s9 + $0x130] sm:$0xff] %v870_v39  ;;  %v872_v15 = vpop.f32.mrb[27].mxu1  ;;  %v1128_v17 = vpack.c.bf16 %v3005_v14, %v2998_v13  ;;  %v1075_v16 = vpop.f32.mrb[59].mxu0 }
 0x389   : > { %955 = vst.msk [vmem:[%s2928_s9 + $0x138] sm:$0xff] %vm916_vm8, %v872_v15  ;;  %v1127_v18 = vpack.c.bf16 %v1075_v16, %v3001_v38 }
 0x38b   : > { %2012 = vmatmul.mubr.msk.bf16.gmra.mrb[84].mxu0 %vm248_vm0, %v1123_v62 }
 0x38c   : > { %1257 = vmatprep.mubr.bf16.mxu0 %v2538_v0 }
 0x38d   : > { %v876_v19 = vpop.f32.mrb[28].mxu1  ;;  %v3015_v20 = vpop.f32.mrb[60].mxu0 }
 0x38e   : > { %956 = vst [vmem:[%s2928_s9 + $0x140] sm:$0xff] %v876_v19  ;;  %v878_v10 = vpop.f32.mrb[29].mxu1  ;;  %v3018_v21 = vpop.f32.mrb[61].mxu0 }
 0x38f   : > { %957 = vst.msk [vmem:[%s2928_s9 + $0x148] sm:$0xff] %vm916_vm8, %v878_v10  ;;  %v880_v22 = vpop.f32.mrb[30].mxu1  ;;  %v3022_v23 = vpop.f32.mrb[62].mxu0 }
 0x390   : > { %958 = vst [vmem:[%s2928_s9 + $0x150] sm:$0xff] %v880_v22  ;;  %v882_v24 = vpop.f32.mrb[31].mxu1  ;;  %v1130_v25 = vpack.c.bf16 %v3022_v23, %v3015_v20  ;;  %v1091_v26 = vpop.f32.mrb[63].mxu0 }
 0x391   : > { %959 = vst.msk [vmem:[%s2928_s9 + $0x158] sm:$0xff] %vm916_vm8, %v882_v24  ;;  %v1129_v27 = vpack.c.bf16 %v1091_v26, %v3018_v21 }
 0x393   : > { %2013 = vmatmul.mubr.msk.bf16.gmra.mrb[88].mxu0 %vm248_vm0, %v1124_v60 }
 0x394   : > { %1267 = vmatprep.mubr.bf16.mxu0 %v2538_v0 }
 0x395   : > { %v886_v28 = vpop.f32.mrb[32].mxu1  ;;  %v3032_v29 = vpop.f32.mrb[64].mxu0 }
 0x396   : > { %960 = vst [vmem:[%s2928_s9 + $0x160] sm:$0xff] %v886_v28  ;;  %v888_v30 = vpop.f32.mrb[33].mxu1  ;;  %v3035_v31 = vpop.f32.mrb[65].mxu0 }
 0x397   : > { %961 = vst.msk [vmem:[%s2928_s9 + $0x168] sm:$0xff] %vm916_vm8, %v888_v30  ;;  %v890_v32 = vpop.f32.mrb[34].mxu1  ;;  %v3039_v33 = vpop.f32.mrb[66].mxu0 }
 0x398   : > { %962 = vst [vmem:[%s2928_s9 + $0x170] sm:$0xff] %v890_v32  ;;  %v892_v34 = vpop.f32.mrb[35].mxu1  ;;  %v1132_v35 = vpack.c.bf16 %v3039_v33, %v3032_v29  ;;  %v3044_v36 = vpop.f32.mrb[67].mxu0 }
 0x399   : > { %963 = vst.msk [vmem:[%s2928_s9 + $0x178] sm:$0xff] %vm916_vm8, %v892_v34  ;;  %v1131_v40 = vpack.c.bf16 %v3044_v36, %v3035_v31 }
 0x39b   : > { %2014 = vmatmul.mubr.msk.bf16.gmra.mrb[92].mxu0 %vm248_vm0, %v1125_v9 }
 0x39c   : > { %1277 = vmatprep.mubr.bf16.mxu0 %v2538_v0 }
 0x39d   : > { %v896_v41 = vpop.f32.mrb[36].mxu1 }
 0x39e   : > { %964 = vst [vmem:[%s2928_s9 + $0x180] sm:$0xff] %v896_v41  ;;  %v898_v42 = vpop.f32.mrb[37].mxu1 }
 0x39f   : > { %965 = vst.msk [vmem:[%s2928_s9 + $0x188] sm:$0xff] %vm916_vm8, %v898_v42  ;;  %v900_v43 = vpop.f32.mrb[38].mxu1 }
 0x3a0   : > { %966 = vst [vmem:[%s2928_s9 + $0x190] sm:$0xff] %v900_v43  ;;  %v902_v44 = vpop.f32.mrb[39].mxu1 }
 0x3a1   : > { %967 = vst.msk [vmem:[%s2928_s9 + $0x198] sm:$0xff] %vm916_vm8, %v902_v44 }
 0x3a3   : > { %2015 = vmatmul.mubr.msk.bf16.gmra.mrb[96].mxu0 %vm248_vm0, %v1126_v7 }
 0x3a4   : > { %1287 = vmatprep.mubr.bf16.mxu0 %v2538_v0 }
 0x3a5   : > { %v906_v45 = vpop.f32.mrb[40].mxu1 }
 0x3a6   : > { %968 = vst [vmem:[%s2928_s9 + $0x1a0] sm:$0xff] %v906_v45  ;;  %v908_v46 = vpop.f32.mrb[41].mxu1 }
 0x3a7   : > { %969 = vst.msk [vmem:[%s2928_s9 + $0x1a8] sm:$0xff] %vm916_vm8, %v908_v46  ;;  %v910_v47 = vpop.f32.mrb[42].mxu1 }
 0x3a8   : > { %970 = vst [vmem:[%s2928_s9 + $0x1b0] sm:$0xff] %v910_v47  ;;  %v912_v48 = vpop.f32.mrb[43].mxu1 }
 0x3a9   : > { %971 = vst.msk [vmem:[%s2928_s9 + $0x1b8] sm:$0xff] %vm916_vm8, %v912_v48 }
 0x3ab   : > { %2016 = vmatmul.mubr.msk.bf16.gmra.mrb[100].mxu0 %vm248_vm0, %v1127_v18 }
 0x3ac   : > { %1297 = vmatprep.mubr.bf16.mxu0 %v2538_v0 }
 0x3ad   : > { %v2274_v49 = vpop.f32.mrb[44].mxu1 }
 0x3ae   : > { %v1441_v50 = vpop.f32.mrb[45].mxu1 }
 0x3af   : > { %v2275_v51 = vpop.f32.mrb[46].mxu1 }
 0x3b0   : > { %v1553_v52 = vpack.c.bf16 %v2275_v51, %v2274_v49  ;;  %v1444_v53 = vpop.f32.mrb[47].mxu1 }
 0x3b1   : > { %v1552_v54 = vpack.c.bf16 %v1444_v53, %v1441_v50 }
 0x3b3   : > { %2092 = vmatmul.mubr.msk.bf16.vlgmr.msra.gmra.mrb[72].mxu1 %vm248_vm0, %v1552_v54  ;;  %2017 = vmatmul.mubr.msk.bf16.gmra.mrb[104].mxu0 %vm248_vm0, %v1128_v17 }
 0x3b4   : > { %1650 = vmatprep.mubr.bf16.mxu1 %v2538_v0  ;;  %1307 = vmatprep.mubr.bf16.mxu0 %v2538_v0 }
 0x3b5   : > { %v2278_v55 = vpop.f32.mrb[48].mxu1 }
 0x3b6   : > { %v1457_v56 = vpop.f32.mrb[49].mxu1 }
 0x3b7   : > { %v2279_v57 = vpop.f32.mrb[50].mxu1 }
 0x3b8   : > { %v1555_v37 = vpack.c.bf16 %v2279_v57, %v2278_v55  ;;  %v1460_v58 = vpop.f32.mrb[51].mxu1 }
 0x3b9   : > { %v1554_v59 = vpack.c.bf16 %v1460_v58, %v1457_v56 }
 0x3bb   : > { %2093 = vmatmul.mubr.msk.bf16.gmra.mrb[76].mxu1 %vm248_vm0, %v1553_v52  ;;  %2018 = vmatmul.mubr.msk.bf16.gmra.mrb[108].mxu0 %vm248_vm0, %v1129_v27 }
 0x3bc   : > { %1660 = vmatprep.mubr.bf16.mxu1 %v2538_v0  ;;  %1317 = vmatprep.mubr.bf16.mxu0 %v2538_v0 }
 0x3bd   : > { %v2282_v60 = vpop.f32.mrb[52].mxu1 }
 0x3be   : > { %v1473_v61 = vpop.f32.mrb[53].mxu1 }
 0x3bf   : > { %v2283_v62 = vpop.f32.mrb[54].mxu1 }
 0x3c0   : > { %v1557_v63 = vpack.c.bf16 %v2283_v62, %v2282_v60  ;;  %v1476_v1 = vpop.f32.mrb[55].mxu1 }
 0x3c1   : > { %v1556_v2 = vpack.c.bf16 %v1476_v1, %v1473_v61 }
 0x3c3   : > { %2094 = vmatmul.mubr.msk.bf16.gmra.mrb[80].mxu1 %vm248_vm0, %v1554_v59  ;;  %2019 = vmatmul.mubr.msk.bf16.gmra.mrb[112].mxu0 %vm248_vm0, %v1130_v25 }
 0x3c4   : > { %1670 = vmatprep.mubr.bf16.mxu1 %v2538_v0  ;;  %1327 = vmatprep.mubr.bf16.mxu0 %v2538_v0 }
 0x3c5   : > { %v2286_v3 = vpop.f32.mrb[56].mxu1 }
 0x3c6   : > { %v1489_v4 = vpop.f32.mrb[57].mxu1 }
 0x3c7   : > { %v2287_v5 = vpop.f32.mrb[58].mxu1 }
 0x3c8   : > { %v1559_v6 = vpack.c.bf16 %v2287_v5, %v2286_v3  ;;  %v1492_v7 = vpop.f32.mrb[59].mxu1 }
 0x3c9   : > { %v1558_v8 = vpack.c.bf16 %v1492_v7, %v1489_v4 }
 0x3cb   : > { %2095 = vmatmul.mubr.msk.bf16.gmra.mrb[84].mxu1 %vm248_vm0, %v1555_v37  ;;  %2020 = vmatmul.mubr.msk.bf16.gmra.mrb[116].mxu0 %vm248_vm0, %v1131_v40 }
 0x3cc   : > { %1680 = vmatprep.mubr.bf16.mxu1 %v2538_v0  ;;  %1337 = vmatprep.mubr.bf16.mxu0 %v2538_v0 }
 0x3cd   : > { %v2290_v9 = vpop.f32.mrb[60].mxu1 }
 0x3ce   : > { %v1505_v11 = vpop.f32.mrb[61].mxu1 }
 0x3cf   : > { %v2291_v13 = vpop.f32.mrb[62].mxu1 }
 0x3d0   : > { %v1561_v12 = vpack.c.bf16 %v2291_v13, %v2290_v9  ;;  %v1508_v38 = vpop.f32.mrb[63].mxu1 }
 0x3d1   : > { %v1560_v39 = vpack.c.bf16 %v1508_v38, %v1505_v11 }
 0x3d3   : > { %2096 = vmatmul.mubr.msk.bf16.gmra.mrb[88].mxu1 %vm248_vm0, %v1556_v2  ;;  %2021 = vmatmul.mubr.msk.bf16.gmra.mrb[120].mxu0 %vm248_vm0, %v1132_v35 }
 0x3d4   : > { %1690 = vmatprep.mubr.bf16.mxu1 %v2538_v0 }
 0x3d5   : > { %v2294_v14 = vpop.f32.mrb[64].mxu1 }
 0x3d6   : > { %v1521_v15 = vpop.f32.mrb[65].mxu1 }
 0x3d7   : > { %v2295_v17 = vpop.f32.mrb[66].mxu1 }
 0x3d8   : > { %v1563_v16 = vpack.c.bf16 %v2295_v17, %v2294_v14  ;;  %v1524_v18 = vpop.f32.mrb[67].mxu1 }
 0x3d9   : > { %v1562_v19 = vpack.c.bf16 %v1524_v18, %v1521_v15 }
 0x3db   : > { %2097 = vmatmul.mubr.msk.bf16.gmra.mrb[92].mxu1 %vm248_vm0, %v1557_v63 }
 0x3dc   : > { %1700 = vmatprep.mubr.bf16.mxu1 %v2538_v0 }
 0x3dd   : > { %v2298_v20 = vpop.f32.mrb[68].mxu1 }
 0x3de   : > { %v1537_v10 = vpop.f32.mrb[69].mxu1 }
 0x3df   : > { %v2299_v21 = vpop.f32.mrb[70].mxu1 }
 0x3e0   : > { %v1565_v22 = vpack.c.bf16 %v2299_v21, %v2298_v20  ;;  %v1540_v23 = vpop.f32.mrb[71].mxu1 }
 0x3e1   : > { %v1564_v24 = vpack.c.bf16 %v1540_v23, %v1537_v10 }
 0x3e3   : > { %2098 = vmatmul.mubr.msk.bf16.gmra.mrb[96].mxu1 %vm248_vm0, %v1558_v8 }
 0x3e4   : > { %1710 = vmatprep.mubr.bf16.mxu1 %v2538_v0 }
 0x3eb   : > { %2099 = vmatmul.mubr.msk.bf16.gmra.mrb[100].mxu1 %vm248_vm0, %v1559_v6 }
 0x3ec   : > { %1720 = vmatprep.mubr.bf16.mxu1 %v2538_v0 }
 0x3f3   : > { %2100 = vmatmul.mubr.msk.bf16.gmra.mrb[104].mxu1 %vm248_vm0, %v1560_v39 }
 0x3f4   : > { %1730 = vmatprep.mubr.bf16.mxu1 %v2538_v0 }
 0x3fb   : > { %2101 = vmatmul.mubr.msk.bf16.gmra.mrb[108].mxu1 %vm248_vm0, %v1561_v12 }
 0x3fc   : > { %1740 = vmatprep.mubr.bf16.mxu1 %v2538_v0 }
 0x403   : > { %2102 = vmatmul.mubr.msk.bf16.gmra.mrb[112].mxu1 %vm248_vm0, %v1562_v19 }
 0x404   : > { %1750 = vmatprep.mubr.bf16.mxu1 %v2538_v0 }
 0x40b   : > { %2103 = vmatmul.mubr.msk.bf16.gmra.mrb[116].mxu1 %vm248_vm0, %v1563_v16 }
 0x40c   : > { %1760 = vmatprep.mubr.bf16.mxu1 %v2538_v0 }
 0x413   : > { %2104 = vmatmul.mubr.msk.bf16.gmra.mrb[120].mxu1 %vm248_vm0, %v1564_v24 }
 0x414   : > { %1770 = vmatprep.mubr.bf16.mxu1 %v2538_v0 }
 0x41b   : > { %2105 = vmatmul.mubr.msk.bf16.gmra.mrb[124].mxu1 %vm248_vm0, %v1565_v22 }
 0x43e   : > { %v1209_v25 = vpop.f32.mrb[68].mxu0 }
 0x43f   : > { %2022 = vst [vmem:[%s2928_s9 + $0x1c0] sm:$0xff] %v1209_v25  ;;  %v1211_v26 = vpop.f32.mrb[69].mxu0 }
 0x440   : > { %2023 = vst.msk [vmem:[%s2928_s9 + $0x1c8] sm:$0xff] %vm916_vm8, %v1211_v26  ;;  %v1213_v27 = vpop.f32.mrb[70].mxu0 }
 0x441   : > { %2024 = vst [vmem:[%s2928_s9 + $0x1d0] sm:$0xff] %v1213_v27  ;;  %v1215_v28 = vpop.f32.mrb[71].mxu0 }
 0x442   : > { %2025 = vst.msk [vmem:[%s2928_s9 + $0x1d8] sm:$0xff] %vm916_vm8, %v1215_v28 }
 0x446   : > { %v1219_v29 = vpop.f32.mrb[72].mxu0 }
 0x447   : > { %2026 = vst [vmem:[%s2928_s9 + $0x1e0] sm:$0xff] %v1219_v29  ;;  %v1221_v0 = vpop.f32.mrb[73].mxu0 }
 0x448   : > { %2027 = vst.msk [vmem:[%s2928_s9 + $0x1e8] sm:$0xff] %vm916_vm8, %v1221_v0  ;;  %v1223_v30 = vpop.f32.mrb[74].mxu0 }
 0x449   : > { %2028 = vst [vmem:[%s2928_s9 + $0x1f0] sm:$0xff] %v1223_v30  ;;  %v1225_v31 = vpop.f32.mrb[75].mxu0 }
 0x44a   : > { %2029 = vst.msk [vmem:[%s2928_s9 + $0x1f8] sm:$0xff] %vm916_vm8, %v1225_v31 }
 0x44e   : > { %v1229_v32 = vpop.f32.mrb[76].mxu0 }
 0x44f   : > { %2030 = vst [vmem:[%s2928_s9 + $0x200] sm:$0xff] %v1229_v32  ;;  %v1231_v33 = vpop.f32.mrb[77].mxu0 }
 0x450   : > { %2031 = vst.msk [vmem:[%s2928_s9 + $0x208] sm:$0xff] %vm916_vm8, %v1231_v33  ;;  %v1233_v34 = vpop.f32.mrb[78].mxu0 }
 0x451   : > { %2032 = vst [vmem:[%s2928_s9 + $0x210] sm:$0xff] %v1233_v34  ;;  %v1235_v35 = vpop.f32.mrb[79].mxu0 }
 0x452   : > { %2033 = vst.msk [vmem:[%s2928_s9 + $0x218] sm:$0xff] %vm916_vm8, %v1235_v35 }
 0x456   : > { %v1239_v36 = vpop.f32.mrb[80].mxu0 }
 0x457   : > { %2034 = vst [vmem:[%s2928_s9 + $0x220] sm:$0xff] %v1239_v36  ;;  %v1241_v40 = vpop.f32.mrb[81].mxu0 }
 0x458   : > { %2035 = vst.msk [vmem:[%s2928_s9 + $0x228] sm:$0xff] %vm916_vm8, %v1241_v40  ;;  %v1243_v41 = vpop.f32.mrb[82].mxu0 }
 0x459   : > { %2036 = vst [vmem:[%s2928_s9 + $0x230] sm:$0xff] %v1243_v41  ;;  %v1245_v42 = vpop.f32.mrb[83].mxu0 }
 0x45a   : > { %2037 = vst.msk [vmem:[%s2928_s9 + $0x238] sm:$0xff] %vm916_vm8, %v1245_v42 }
 0x45e   : > { %v1249_v43 = vpop.f32.mrb[84].mxu0 }
 0x45f   : > { %2038 = vst [vmem:[%s2928_s9 + $0x240] sm:$0xff] %v1249_v43  ;;  %v1251_v44 = vpop.f32.mrb[85].mxu0 }
 0x460   : > { %2039 = vst.msk [vmem:[%s2928_s9 + $0x248] sm:$0xff] %vm916_vm8, %v1251_v44  ;;  %v1253_v45 = vpop.f32.mrb[86].mxu0 }
 0x461   : > { %2040 = vst [vmem:[%s2928_s9 + $0x250] sm:$0xff] %v1253_v45  ;;  %v1255_v46 = vpop.f32.mrb[87].mxu0 }
 0x462   : > { %2041 = vst.msk [vmem:[%s2928_s9 + $0x258] sm:$0xff] %vm916_vm8, %v1255_v46 }
 0x466   : > { %v1259_v47 = vpop.f32.mrb[88].mxu0 }
 0x467   : > { %2042 = vst [vmem:[%s2928_s9 + $0x260] sm:$0xff] %v1259_v47  ;;  %v1261_v48 = vpop.f32.mrb[89].mxu0 }
 0x468   : > { %2043 = vst.msk [vmem:[%s2928_s9 + $0x268] sm:$0xff] %vm916_vm8, %v1261_v48  ;;  %v1263_v49 = vpop.f32.mrb[90].mxu0 }
 0x469   : > { %2044 = vst [vmem:[%s2928_s9 + $0x270] sm:$0xff] %v1263_v49  ;;  %v1265_v50 = vpop.f32.mrb[91].mxu0 }
 0x46a   : > { %2045 = vst.msk [vmem:[%s2928_s9 + $0x278] sm:$0xff] %vm916_vm8, %v1265_v50 }
 0x46e   : > { %v1269_v51 = vpop.f32.mrb[92].mxu0 }
 0x46f   : > { %2046 = vst [vmem:[%s2928_s9 + $0x280] sm:$0xff] %v1269_v51  ;;  %v1271_v52 = vpop.f32.mrb[93].mxu0 }
 0x470   : > { %2047 = vst.msk [vmem:[%s2928_s9 + $0x288] sm:$0xff] %vm916_vm8, %v1271_v52  ;;  %v1273_v53 = vpop.f32.mrb[94].mxu0 }
 0x471   : > { %2048 = vst [vmem:[%s2928_s9 + $0x290] sm:$0xff] %v1273_v53  ;;  %v1275_v54 = vpop.f32.mrb[95].mxu0 }
 0x472   : > { %2049 = vst.msk [vmem:[%s2928_s9 + $0x298] sm:$0xff] %vm916_vm8, %v1275_v54 }
 0x476   : > { %v1279_v55 = vpop.f32.mrb[96].mxu0 }
 0x477   : > { %2050 = vst [vmem:[%s2928_s9 + $0x2a0] sm:$0xff] %v1279_v55  ;;  %v1281_v56 = vpop.f32.mrb[97].mxu0 }
 0x478   : > { %2051 = vst.msk [vmem:[%s2928_s9 + $0x2a8] sm:$0xff] %vm916_vm8, %v1281_v56  ;;  %v1283_v57 = vpop.f32.mrb[98].mxu0 }
 0x479   : > { %2052 = vst [vmem:[%s2928_s9 + $0x2b0] sm:$0xff] %v1283_v57  ;;  %v1285_v37 = vpop.f32.mrb[99].mxu0 }
 0x47a   : > { %2053 = vst.msk [vmem:[%s2928_s9 + $0x2b8] sm:$0xff] %vm916_vm8, %v1285_v37 }
 0x47e   : > { %v1289_v58 = vpop.f32.mrb[100].mxu0 }
 0x47f   : > { %2054 = vst [vmem:[%s2928_s9 + $0x2c0] sm:$0xff] %v1289_v58  ;;  %v1291_v59 = vpop.f32.mrb[101].mxu0 }
 0x480   : > { %2055 = vst.msk [vmem:[%s2928_s9 + $0x2c8] sm:$0xff] %vm916_vm8, %v1291_v59  ;;  %v1293_v60 = vpop.f32.mrb[102].mxu0 }
 0x481   : > { %2056 = vst [vmem:[%s2928_s9 + $0x2d0] sm:$0xff] %v1293_v60  ;;  %v1295_v61 = vpop.f32.mrb[103].mxu0 }
 0x482   : > { %2057 = vst.msk [vmem:[%s2928_s9 + $0x2d8] sm:$0xff] %vm916_vm8, %v1295_v61 }
 0x486   : > { %v1642_v62 = vpop.f32.mrb[72].mxu1  ;;  %v1299_v63 = vpop.f32.mrb[104].mxu0 }
 0x487   : > { %2106 = vst [vmem:[%s2928_s9 + $0x380] sm:$0xff] %v1642_v62  ;;  %v1644_v1 = vpop.f32.mrb[73].mxu1  ;;  %2058 = vst [vmem:[%s2928_s9 + $0x2e0] sm:$0xff] %v1299_v63  ;;  %v1301_v2 = vpop.f32.mrb[105].mxu0 }
 0x488   : > { %2107 = vst.msk [vmem:[%s2928_s9 + $0x388] sm:$0xff] %vm916_vm8, %v1644_v1  ;;  %v1646_v3 = vpop.f32.mrb[74].mxu1  ;;  %2059 = vst.msk [vmem:[%s2928_s9 + $0x2e8] sm:$0xff] %vm916_vm8, %v1301_v2  ;;  %v1303_v4 = vpop.f32.mrb[106].mxu0 }
 0x489   : > { %2108 = vst [vmem:[%s2928_s9 + $0x390] sm:$0xff] %v1646_v3  ;;  %v1648_v5 = vpop.f32.mrb[75].mxu1  ;;  %2060 = vst [vmem:[%s2928_s9 + $0x2f0] sm:$0xff] %v1303_v4  ;;  %v1305_v6 = vpop.f32.mrb[107].mxu0 }
 0x48a   : > { %2109 = vst.msk [vmem:[%s2928_s9 + $0x398] sm:$0xff] %vm916_vm8, %v1648_v5  ;;  %2061 = vst.msk [vmem:[%s2928_s9 + $0x2f8] sm:$0xff] %vm916_vm8, %v1305_v6 }
 0x48e   : > { %v1652_v7 = vpop.f32.mrb[76].mxu1  ;;  %v1309_v8 = vpop.f32.mrb[108].mxu0 }
 0x48f   : > { %2110 = vst [vmem:[%s2928_s9 + $0x3a0] sm:$0xff] %v1652_v7  ;;  %v1654_v9 = vpop.f32.mrb[77].mxu1  ;;  %2062 = vst [vmem:[%s2928_s9 + $0x300] sm:$0xff] %v1309_v8  ;;  %v1311_v11 = vpop.f32.mrb[109].mxu0 }
 0x490   : > { %2111 = vst.msk [vmem:[%s2928_s9 + $0x3a8] sm:$0xff] %vm916_vm8, %v1654_v9  ;;  %v1656_v13 = vpop.f32.mrb[78].mxu1  ;;  %2063 = vst.msk [vmem:[%s2928_s9 + $0x308] sm:$0xff] %vm916_vm8, %v1311_v11  ;;  %v1313_v12 = vpop.f32.mrb[110].mxu0 }
 0x491   : > { %2112 = vst [vmem:[%s2928_s9 + $0x3b0] sm:$0xff] %v1656_v13  ;;  %v1658_v38 = vpop.f32.mrb[79].mxu1  ;;  %2064 = vst [vmem:[%s2928_s9 + $0x310] sm:$0xff] %v1313_v12  ;;  %v1315_v39 = vpop.f32.mrb[111].mxu0 }
 0x492   : > { %2113 = vst.msk [vmem:[%s2928_s9 + $0x3b8] sm:$0xff] %vm916_vm8, %v1658_v38  ;;  %2065 = vst.msk [vmem:[%s2928_s9 + $0x318] sm:$0xff] %vm916_vm8, %v1315_v39 }
 0x496   : > { %v1662_v14 = vpop.f32.mrb[80].mxu1  ;;  %v1319_v15 = vpop.f32.mrb[112].mxu0 }
 0x497   : > { %2114 = vst [vmem:[%s2928_s9 + $0x3c0] sm:$0xff] %v1662_v14  ;;  %v1664_v17 = vpop.f32.mrb[81].mxu1  ;;  %2066 = vst [vmem:[%s2928_s9 + $0x320] sm:$0xff] %v1319_v15  ;;  %v1321_v16 = vpop.f32.mrb[113].mxu0 }
 0x498   : > { %2115 = vst.msk [vmem:[%s2928_s9 + $0x3c8] sm:$0xff] %vm916_vm8, %v1664_v17  ;;  %v1666_v18 = vpop.f32.mrb[82].mxu1  ;;  %2067 = vst.msk [vmem:[%s2928_s9 + $0x328] sm:$0xff] %vm916_vm8, %v1321_v16  ;;  %v1323_v19 = vpop.f32.mrb[114].mxu0 }
 0x499   : > { %2116 = vst [vmem:[%s2928_s9 + $0x3d0] sm:$0xff] %v1666_v18  ;;  %v1668_v20 = vpop.f32.mrb[83].mxu1  ;;  %2068 = vst [vmem:[%s2928_s9 + $0x330] sm:$0xff] %v1323_v19  ;;  %v1325_v10 = vpop.f32.mrb[115].mxu0 }
 0x49a   : > { %2117 = vst.msk [vmem:[%s2928_s9 + $0x3d8] sm:$0xff] %vm916_vm8, %v1668_v20  ;;  %2069 = vst.msk [vmem:[%s2928_s9 + $0x338] sm:$0xff] %vm916_vm8, %v1325_v10 }
 0x49e   : > { %v1672_v21 = vpop.f32.mrb[84].mxu1  ;;  %v1329_v22 = vpop.f32.mrb[116].mxu0 }
 0x49f   : > { %2118 = vst [vmem:[%s2928_s9 + $0x3e0] sm:$0xff] %v1672_v21  ;;  %v1674_v23 = vpop.f32.mrb[85].mxu1  ;;  %2070 = vst [vmem:[%s2928_s9 + $0x340] sm:$0xff] %v1329_v22  ;;  %v1331_v24 = vpop.f32.mrb[117].mxu0 }
 0x4a0   : > { %2119 = vst.msk [vmem:[%s2928_s9 + $0x3e8] sm:$0xff] %vm916_vm8, %v1674_v23  ;;  %v1676_v25 = vpop.f32.mrb[86].mxu1  ;;  %2071 = vst.msk [vmem:[%s2928_s9 + $0x348] sm:$0xff] %vm916_vm8, %v1331_v24  ;;  %v1333_v26 = vpop.f32.mrb[118].mxu0 }
 0x4a1   : > { %2120 = vst [vmem:[%s2928_s9 + $0x3f0] sm:$0xff] %v1676_v25  ;;  %v1678_v27 = vpop.f32.mrb[87].mxu1  ;;  %2072 = vst [vmem:[%s2928_s9 + $0x350] sm:$0xff] %v1333_v26  ;;  %v1335_v28 = vpop.f32.mrb[119].mxu0 }
 0x4a2   : > { %2121 = vst.msk [vmem:[%s2928_s9 + $0x3f8] sm:$0xff] %vm916_vm8, %v1678_v27  ;;  %2073 = vst.msk [vmem:[%s2928_s9 + $0x358] sm:$0xff] %vm916_vm8, %v1335_v28 }
 0x4a6   : > { %v1682_v29 = vpop.f32.mrb[88].mxu1  ;;  %v1339_v0 = vpop.f32.mrb[120].mxu0 }
 0x4a7   : > { %2122 = vst [vmem:[%s2928_s9 + $0x400] sm:$0xff] %v1682_v29  ;;  %v1684_v30 = vpop.f32.mrb[89].mxu1  ;;  %2074 = vst [vmem:[%s2928_s9 + $0x360] sm:$0xff] %v1339_v0  ;;  %v1341_v31 = vpop.f32.mrb[121].mxu0 }
 0x4a8   : > { %2123 = vst.msk [vmem:[%s2928_s9 + $0x408] sm:$0xff] %vm916_vm8, %v1684_v30  ;;  %v1686_v32 = vpop.f32.mrb[90].mxu1  ;;  %2075 = vst.msk [vmem:[%s2928_s9 + $0x368] sm:$0xff] %vm916_vm8, %v1341_v31  ;;  %v1343_v33 = vpop.f32.mrb[122].mxu0 }
 0x4a9   : > { %2124 = vst [vmem:[%s2928_s9 + $0x410] sm:$0xff] %v1686_v32  ;;  %v1688_v34 = vpop.f32.mrb[91].mxu1  ;;  %2076 = vst [vmem:[%s2928_s9 + $0x370] sm:$0xff] %v1343_v33  ;;  %v1345_v35 = vpop.f32.mrb[123].mxu0 }
 0x4aa   : > { %2125 = vst.msk [vmem:[%s2928_s9 + $0x418] sm:$0xff] %vm916_vm8, %v1688_v34  ;;  %2077 = vst.msk [vmem:[%s2928_s9 + $0x378] sm:$0xff] %vm916_vm8, %v1345_v35 }
 0x4ae   : > { %v1692_v36 = vpop.f32.mrb[92].mxu1 }
 0x4af   : > { %2126 = vst [vmem:[%s2928_s9 + $0x420] sm:$0xff] %v1692_v36  ;;  %v1694_v40 = vpop.f32.mrb[93].mxu1 }
 0x4b0   : > { %2127 = vst.msk [vmem:[%s2928_s9 + $0x428] sm:$0xff] %vm916_vm8, %v1694_v40  ;;  %v1696_v41 = vpop.f32.mrb[94].mxu1 }
 0x4b1   : > { %2128 = vst [vmem:[%s2928_s9 + $0x430] sm:$0xff] %v1696_v41  ;;  %v1698_v42 = vpop.f32.mrb[95].mxu1 }
 0x4b2   : > { %2129 = vst.msk [vmem:[%s2928_s9 + $0x438] sm:$0xff] %vm916_vm8, %v1698_v42 }
 0x4b6   : > { %v1702_v43 = vpop.f32.mrb[96].mxu1 }
 0x4b7   : > { %2130 = vst [vmem:[%s2928_s9 + $0x440] sm:$0xff] %v1702_v43  ;;  %v1704_v44 = vpop.f32.mrb[97].mxu1 }
 0x4b8   : > { %2131 = vst.msk [vmem:[%s2928_s9 + $0x448] sm:$0xff] %vm916_vm8, %v1704_v44  ;;  %v1706_v45 = vpop.f32.mrb[98].mxu1 }
 0x4b9   : > { %2132 = vst [vmem:[%s2928_s9 + $0x450] sm:$0xff] %v1706_v45  ;;  %v1708_v46 = vpop.f32.mrb[99].mxu1 }
 0x4ba   : > { %2133 = vst.msk [vmem:[%s2928_s9 + $0x458] sm:$0xff] %vm916_vm8, %v1708_v46 }
 0x4be   : > { %v1712_v47 = vpop.f32.mrb[100].mxu1 }
 0x4bf   : > { %2134 = vst [vmem:[%s2928_s9 + $0x460] sm:$0xff] %v1712_v47  ;;  %v1714_v48 = vpop.f32.mrb[101].mxu1 }
 0x4c0   : > { %2135 = vst.msk [vmem:[%s2928_s9 + $0x468] sm:$0xff] %vm916_vm8, %v1714_v48  ;;  %v1716_v49 = vpop.f32.mrb[102].mxu1 }
 0x4c1   : > { %2136 = vst [vmem:[%s2928_s9 + $0x470] sm:$0xff] %v1716_v49  ;;  %v1718_v50 = vpop.f32.mrb[103].mxu1 }
 0x4c2   : > { %2137 = vst.msk [vmem:[%s2928_s9 + $0x478] sm:$0xff] %vm916_vm8, %v1718_v50 }
 0x4c6   : > { %v1722_v51 = vpop.f32.mrb[104].mxu1 }
 0x4c7   : > { %2138 = vst [vmem:[%s2928_s9 + $0x480] sm:$0xff] %v1722_v51  ;;  %v1724_v52 = vpop.f32.mrb[105].mxu1 }
 0x4c8   : > { %2139 = vst.msk [vmem:[%s2928_s9 + $0x488] sm:$0xff] %vm916_vm8, %v1724_v52  ;;  %v1726_v53 = vpop.f32.mrb[106].mxu1 }
 0x4c9   : > { %2140 = vst [vmem:[%s2928_s9 + $0x490] sm:$0xff] %v1726_v53  ;;  %v1728_v54 = vpop.f32.mrb[107].mxu1 }
 0x4ca   : > { %2141 = vst.msk [vmem:[%s2928_s9 + $0x498] sm:$0xff] %vm916_vm8, %v1728_v54 }
 0x4ce   : > { %v1732_v55 = vpop.f32.mrb[108].mxu1 }
 0x4cf   : > { %2142 = vst [vmem:[%s2928_s9 + $0x4a0] sm:$0xff] %v1732_v55  ;;  %v1734_v56 = vpop.f32.mrb[109].mxu1 }
 0x4d0   : > { %2143 = vst.msk [vmem:[%s2928_s9 + $0x4a8] sm:$0xff] %vm916_vm8, %v1734_v56  ;;  %v1736_v57 = vpop.f32.mrb[110].mxu1 }
 0x4d1   : > { %2144 = vst [vmem:[%s2928_s9 + $0x4b0] sm:$0xff] %v1736_v57  ;;  %v1738_v37 = vpop.f32.mrb[111].mxu1 }
 0x4d2   : > { %2145 = vst.msk [vmem:[%s2928_s9 + $0x4b8] sm:$0xff] %vm916_vm8, %v1738_v37 }
 0x4d6   : > { %v1742_v58 = vpop.f32.mrb[112].mxu1 }
 0x4d7   : > { %2146 = vst [vmem:[%s2928_s9 + $0x4c0] sm:$0xff] %v1742_v58  ;;  %v1744_v59 = vpop.f32.mrb[113].mxu1 }
 0x4d8   : > { %2147 = vst.msk [vmem:[%s2928_s9 + $0x4c8] sm:$0xff] %vm916_vm8, %v1744_v59  ;;  %v1746_v60 = vpop.f32.mrb[114].mxu1 }
 0x4d9   : > { %2148 = vst [vmem:[%s2928_s9 + $0x4d0] sm:$0xff] %v1746_v60  ;;  %v1748_v61 = vpop.f32.mrb[115].mxu1 }
 0x4da   : > { %2149 = vst.msk [vmem:[%s2928_s9 + $0x4d8] sm:$0xff] %vm916_vm8, %v1748_v61 }
 0x4de   : > { %v1752_v62 = vpop.f32.mrb[116].mxu1 }
 0x4df   : > { %2150 = vst [vmem:[%s2928_s9 + $0x4e0] sm:$0xff] %v1752_v62  ;;  %v1754_v63 = vpop.f32.mrb[117].mxu1 }
 0x4e0   : > { %2151 = vst.msk [vmem:[%s2928_s9 + $0x4e8] sm:$0xff] %vm916_vm8, %v1754_v63  ;;  %v1756_v1 = vpop.f32.mrb[118].mxu1 }
 0x4e1   : > { %2152 = vst [vmem:[%s2928_s9 + $0x4f0] sm:$0xff] %v1756_v1  ;;  %v1758_v2 = vpop.f32.mrb[119].mxu1 }
 0x4e2   : > { %2153 = vst.msk [vmem:[%s2928_s9 + $0x4f8] sm:$0xff] %vm916_vm8, %v1758_v2 }
 0x4e6   : > { %v1762_v3 = vpop.f32.mrb[120].mxu1 }
 0x4e7   : > { %2154 = vst [vmem:[%s2928_s9 + $0x500] sm:$0xff] %v1762_v3  ;;  %v1764_v4 = vpop.f32.mrb[121].mxu1 }
 0x4e8   : > { %2155 = vst.msk [vmem:[%s2928_s9 + $0x508] sm:$0xff] %vm916_vm8, %v1764_v4  ;;  %v1766_v5 = vpop.f32.mrb[122].mxu1 }
 0x4e9   : > { %2156 = vst [vmem:[%s2928_s9 + $0x510] sm:$0xff] %v1766_v5  ;;  %v1768_v6 = vpop.f32.mrb[123].mxu1 }
 0x4ea   : > { %2157 = vst.msk [vmem:[%s2928_s9 + $0x518] sm:$0xff] %vm916_vm8, %v1768_v6 }
 0x4ee   : > { %v1772_v7 = vpop.f32.mrb[124].mxu1 }
 0x4ef   : > { %2158 = vst [vmem:[%s2928_s9 + $0x520] sm:$0xff] %v1772_v7  ;;  %v1774_v8 = vpop.f32.mrb[125].mxu1 }
 0x4f0   : > { %2159 = vst.msk [vmem:[%s2928_s9 + $0x528] sm:$0xff] %vm916_vm8, %v1774_v8  ;;  %v1776_v9 = vpop.f32.mrb[126].mxu1 }
 0x4f1   : > { %2160 = vst [vmem:[%s2928_s9 + $0x530] sm:$0xff] %v1776_v9  ;;  %v1778_v11 = vpop.f32.mrb[127].mxu1 }
 0x4f2   : > { %2161 = vst.msk [vmem:[%s2928_s9 + $0x538] sm:$0xff] %vm916_vm8, %v1778_v11 }
 0x4f3   : > { %2473 = shalt.err (!%p2470_p9)
}
 0x4f4   : > { %s2474_s28 = scalar_lea.hbm %s3281_s26, 21504  ;;  %s2478_s30 = scalar_lea.hbm %s3335_s3, 43008 }
 0x4f5   : > { %p2475_p2 = scmp.ne.s32.totalorder %s3281_s26, %s2474_s28  ;;  %p2479_p1 = scmp.lt.u32.totalorder %s3281_s26, %s3335_s3 }
 0x4f6   : > { %p2480_p11 = scmp.lt.u32.totalorder %s2478_s30, %s2474_s28  ;;  %p2482_p6 = scmp.lt.u32.totalorder %s2474_s28, %s3281_s26 }
 0x4f7   : > { %p2476_p0 = pnand %p2475_p2, %p2657_p12 }
 0x4f8   : > { %p2481_p4 = por %p2480_p11, %p2479_p1 }
 0x4f9   : > { %p2477_p5 = pneg %p2476_p0 }
 0x4fa   : > { %p2483_p8 = por %p2482_p6, %p2481_p4 }
 0x4fc   : > { %p2484_p10 = pnand %p2483_p8, %p2477_p5 }
 0x4fe   : > { %2487 = shalt.err (!%p2484_p10)
}
 0x4ff   : > { %s2544_s8 = smov 256   ;;  %s2545_s9 = smov 16  }
 0x500   : > { %2315 = dma.vmem_to_hbm [thread:$0]  (%p2657_p12), %s3283_s20, 21504, %s3281_s26, %s1839_s16, %s2544_s8, %s2544_s8, %s2545_s9  }
 0x501 PF: > { %s1867_s18 = sand.u32 1, %s2518_s12   ;;  %p3350_p13 = scmp.ne.s32.totalorder %s3340_s19, 0 }
 0x502   : > { %p3351_p3 = scmp.ge.s32.totalorder %s2530_s15, 2  ;;  %s1868_s4 = scalar_lea.sflag [#allocation5], %s1867_s18 }
 0x504   : > { %p2326_p7 = pnand %p3351_p3, %p3350_p13 }
 0x506   : > { %2513 = dma.done.wait (!%p2326_p7), %s1868_s4, 21504  }
 0x507   : > { %2515 = vsyncadd (!%p2326_p7), %s1868_s4, 4294945792  ;;  %p17_p9 = scmp.ge.s32.totalorder %s2622_s24, 4   ;;  %s3352_s12 = smov %s2522_s13 }
 0x508   : > { %s3353_s13 = smov %s2526_s14  ;;  %s3354_s14 = smov %s2653_s17 }
 0x509   : > { %s3355_s15 = smov %s2622_s24  ;;  %19 = sbr.rel (!%p17_p9) target bundleno = 6 (0x6), region = 89 }
 0x510   :  { %1873 = vsyncpa [#allocation4], 1 }
 0x511   :  { %1875 = vsyncpa [#allocation4 + $0x1], 1 }
 0x512   :  { %1876 = vsyncpa [#allocation7], 1 }
 0x513   :  { %1877 = vsyncpa [#allocation5], 1 }
 0x514   :  { %1879 = vsyncpa [#allocation5 + $0x1], 1 }

</bundles_post_ra>
